<compile_context>
chip_gen: v7x
topology: tpu7x:2x2x1
jax: 0.10.0
libtpu: 0.0.40
codegen_flags: <defaults>
</compile_context>

<pallas_src>
import functools
from itertools import combinations

import numpy as np
import jax
import jax.numpy as jnp
from jax import lax
from jax.experimental import pallas as pl
from jax.experimental.pallas import tpu as pltpu

LANE = 128
SUBLANE = 8


def _aagcn_graph_kernel(B, T, N, x_ref, a_ref, wx_ref, bx_ref, whg_ref,
                        whc_ref, wlin_ref, blin_ref, out_ref, gx_ref):
    """Full forward for the whole batch in a single invocation.

    x_ref   : [T*B*N, F]     agent observations, t-major so each timestep is a
                             contiguous [B*N, F] row slab
    a_ref   : [T*B*N, T*B*N] block-diagonal normalized adjacency kron(I_{T*B}, A)
    wx_ref  : [F, 3H]        GCNConv weights composed with the conv half of the
                             z / r / h gate Linears (concatenated)
    bx_ref  : [1, 3H]        matching fused biases
    whg_ref : [H, 2H]        hidden-half gate weights [wlz_h | wlr_h]
    whc_ref : [H, H]         hidden-half candidate weight wlh_h
    wlin_ref: [H, P_pad]     head Linear weight, zero-padded to 128 lanes
    blin_ref: [1, P_pad]     head Linear bias, zero-padded
    out_ref : [B, P_pad]     pooled logits (first `periods` lanes valid)
    gx_ref  : [T, B*N, 3H]   VMEM scratch for propagated gate pre-activations
    """
    BN = B * N
    Hd = whc_ref.shape[0]

    # Load every weight exactly once (nothing re-read inside the recurrence).
    Whg = whg_ref[...]
    Whc = whc_ref[...]

    # ---- time-independent path: 2 matmuls total, no per-timestep loop -------
    # Feature transform for every timestep and every gate in one MXU push.
    XW = jnp.dot(x_ref[...], wx_ref[...],
                 preferred_element_type=jnp.float32)              # [T*BN, 3H]
    # GCN propagation for every timestep in one MXU push (block-diagonal A),
    # staged in VMEM scratch so the recurrence reads cheap per-t row slabs.
    gx_ref[...] = (jnp.dot(a_ref[...], XW, preferred_element_type=jnp.float32)
                   + bx_ref[...]).reshape(T, BN, 3 * Hd)

    # ---- GRU-style graph recurrence: only H-dependent matmuls remain --------
    def step(t, Hs):
        G = gx_ref[t]                                             # [BN, 3H]
        HW = jnp.dot(Hs, Whg, preferred_element_type=jnp.float32)  # [BN, 2H]
        ZR = jax.nn.sigmoid(G[:, :2 * Hd] + HW)                   # fused z | r
        Z, R = ZR[:, :Hd], ZR[:, Hd:]
        Hc = jnp.tanh(G[:, 2 * Hd:] +
                      jnp.dot(Hs * R, Whc, preferred_element_type=jnp.float32))
        return Z * Hs + (1.0 - Z) * Hc

    Hs = lax.fori_loop(0, T, step, jnp.zeros((BN, Hd), jnp.float32),
                       unroll=True)

    # ---- head: ReLU -> mean over agents -> Linear (pool commuted w/ Linear) -
    m = jnp.mean(jnp.maximum(Hs, 0.0).reshape(B, N, Hd), axis=1)   # [B, H]
    out_ref[...] = (jnp.dot(m, wlin_ref[...],
                            preferred_element_type=jnp.float32) + blin_ref[...])


def build_normalized_adjacency(num_nodes):
    """Dense GCNConv propagation matrix for edge_index = combinations(N, 2)
    (directed i<j edges) + self loops, symmetric gcn_norm with degrees taken on
    the directed edge set (flow = source_to_target), matching the module's
    edge construction."""
    edges = list(combinations(range(num_nodes), 2))
    src = np.array([e[0] for e in edges] + list(range(num_nodes)), dtype=np.int64)
    dst = np.array([e[1] for e in edges] + list(range(num_nodes)), dtype=np.int64)
    w = np.ones(src.shape[0], dtype=np.float32)
    deg = np.zeros(num_nodes, dtype=np.float32)
    np.add.at(deg, dst, w)
    dinv = np.where(deg > 0.0, deg ** -0.5, 0.0).astype(np.float32)
    norm = dinv[src] * w * dinv[dst]
    A = np.zeros((num_nodes, num_nodes), dtype=np.float32)
    np.add.at(A, (dst, src), norm)   # message flows source -> target
    return A


def build_propagation(A, batch_size, seq_len):
    """Block-diagonal kron(I_{T*B}, A) propagation matrix.  Constant given
    (A, B, T): built ONCE at setup time with numpy, never rebuilt per call."""
    A = np.asarray(A, dtype=np.float32)
    blocks = seq_len * batch_size
    return jnp.asarray(np.kron(np.eye(blocks, dtype=np.float32), A))


def init_params(key, node_features, hidden_dim, periods):
    ks = jax.random.split(key, 14)
    w = lambda k, shape: 0.1 * jax.random.normal(k, shape, jnp.float32)
    return dict(
        # GCNConv weight/bias for the update / reset / candidate gates
        wz=w(ks[0], (node_features, hidden_dim)), bz=w(ks[1], (1, hidden_dim)),
        wr=w(ks[2], (node_features, hidden_dim)), br=w(ks[3], (1, hidden_dim)),
        wh=w(ks[4], (node_features, hidden_dim)), bh=w(ks[5], (1, hidden_dim)),
        # gate Linear(2*hidden -> hidden); rows [:hidden] act on the conv
        # output, rows [hidden:] act on H (torch.cat([conv, H], -1) order)
        wlz=w(ks[6], (2 * hidden_dim, hidden_dim)), blz=w(ks[7], (1, hidden_dim)),
        wlr=w(ks[8], (2 * hidden_dim, hidden_dim)), blr=w(ks[9], (1, hidden_dim)),
        wlh=w(ks[10], (2 * hidden_dim, hidden_dim)), blh=w(ks[11], (1, hidden_dim)),
        # head Linear(hidden -> periods)
        wlin=w(ks[12], (hidden_dim, periods)), blin=w(ks[13], (1, periods)),
    )


def fuse_params(params):
    """One-time weight preprocessing (mathematically identical, matmul
    associativity): compose each GCNConv weight with the conv half of its gate
    Linear, concatenate the three gates, fuse the hidden-half z/r weights, and
    pad the head Linear to a lane-dense (multiple of 128) output width."""
    H = params["wz"].shape[1]
    wlz_c, wlz_h = params["wlz"][:H], params["wlz"][H:]
    wlr_c, wlr_h = params["wlr"][:H], params["wlr"][H:]
    wlh_c, wlh_h = params["wlh"][:H], params["wlh"][H:]

    wx = jnp.concatenate([params["wz"] @ wlz_c,
                          params["wr"] @ wlr_c,
                          params["wh"] @ wlh_c], axis=1)                   # [F, 3H]
    bx = jnp.concatenate([params["bz"] @ wlz_c + params["blz"],
                          params["br"] @ wlr_c + params["blr"],
                          params["bh"] @ wlh_c + params["blh"]], axis=1)   # [1, 3H]
    whg = jnp.concatenate([wlz_h, wlr_h], axis=1)                          # [H, 2H]
    whc = wlh_h                                                            # [H, H]

    periods = params["wlin"].shape[1]
    p_pad = max(LANE, ((periods + LANE - 1) // LANE) * LANE)
    wlin = jnp.pad(params["wlin"], ((0, 0), (0, p_pad - periods)))
    blin = jnp.pad(params["blin"], ((0, 0), (0, p_pad - periods)))
    return dict(wx=wx, bx=bx, whg=whg, whc=whc, wlin=wlin, blin=blin,
                periods=int(periods))


def _vmem_limit_bytes(operands, scratch_shapes, out_shape):
    """Conservative VMEM budget from the actual resident whole-array operands:
    pad every array to (8, 128) f32 tiles, sum, add generous compiler-scratch
    headroom.  Acts as a scale-up guard (v7x has 64 MiB/TC vs 128 MiB)."""
    def padded(shape, itemsize):
        shape = (1,) * max(0, 2 - len(shape)) + tuple(shape)
        rows = int(np.prod(shape[:-1]))
        rows = ((rows + SUBLANE - 1) // SUBLANE) * SUBLANE
        cols = ((shape[-1] + LANE - 1) // LANE) * LANE
        return rows * cols * itemsize
    total = sum(padded(a.shape, a.dtype.itemsize) for a in operands)
    total += sum(padded(s, 4) for s in scratch_shapes)
    total += padded(out_shape, 4)
    return int(total) + (8 << 20)   # +8 MiB headroom for compiler internals


def aagcn_graph_forward(fused, A_prop, x):
    """Matches AAGCNGraph.forward:
    x = (agent_obs, hideout_obs, timestep_obs, num_agents)."""
    agent_obs, hideout_obs, timestep_obs, _num_agents = x
    agent_obs = agent_obs.astype(jnp.float32)
    hideout_obs = hideout_obs.astype(jnp.float32)
    timestep_obs = timestep_obs.astype(jnp.float32)

    B, T, N, F = agent_obs.shape
    H = fused["whc"].shape[0]
    periods = fused["periods"]
    p_pad = fused["wlin"].shape[1]

    # [T, B, N, F]: each timestep's rows become one contiguous sublane-aligned
    # slab, so the in-kernel recurrence reads gx_ref[t] for free.
    x_flat = jnp.transpose(agent_obs, (1, 0, 2, 3)).reshape(T * B * N, F)

    operands = (x_flat, A_prop, fused["wx"], fused["bx"], fused["whg"],
                fused["whc"], fused["wlin"], fused["blin"])
    scratch_shapes = [(T, B * N, 3 * H)]
    vmem = pl.BlockSpec(memory_space=pltpu.MemorySpace.VMEM)

    pooled = pl.pallas_call(
        functools.partial(_aagcn_graph_kernel, B, T, N),
        out_shape=jax.ShapeDtypeStruct((B, p_pad), jnp.float32),
        in_specs=[vmem] * len(operands),
        out_specs=vmem,
        scratch_shapes=[pltpu.VMEM(s, jnp.float32) for s in scratch_shapes],
        compiler_params=pltpu.CompilerParams(
            vmem_limit_bytes=_vmem_limit_bytes(operands, scratch_shapes,
                                               (B, p_pad))),
    )(*operands)

    pooled = pooled[:, :periods]     # drop lane padding added for dense stores
    # torch.cat((h, hideout_obs, timestep_obs), dim=-1)
    return jnp.concatenate([pooled, hideout_obs, timestep_obs], axis=-1)


if __name__ == "__main__":
    # Small shapes consistent with the module's forward:
    # agent_obs [batch, seq_len, num_agents, node_features]
    B, T, N, F = 2, 8, 8, 4
    hidden_dim, periods = 32, 8

    key = jax.random.PRNGKey(0)
    k1, k2, k3, kp = jax.random.split(key, 4)
    agent_obs = jax.random.normal(k1, (B, T, N, F), jnp.float32)
    hideout_obs = jax.random.normal(k2, (B, 2), jnp.float32)
    timestep_obs = jax.random.uniform(k3, (B, 1), jnp.float32)

    params = init_params(kp, F, hidden_dim, periods)
    fused = fuse_params(params)
    # Module builds edge_index = combinations(range(num_nodes), 2); build the
    # equivalent normalized dense adjacency and (once) the block-diagonal
    # kron(I_{T*B}, A) propagation matrix for the demo-sized graph.
    A = build_normalized_adjacency(N)
    A_prop = build_propagation(A, B, T)

    x = (agent_obs, hideout_obs, timestep_obs, N)
    out = aagcn_graph_forward(fused, A_prop, x)
    jax.block_until_ready(out)
    assert out.shape == (B, periods + hideout_obs.shape[1] + timestep_obs.shape[1])
    print("KERNEL_OK")
</pallas_src>

<mosaic_0001>
module attributes {stable_mosaic.version = 11 : i64} {
  func.func @_aagcn_graph_kernel(%arg0: memref<128x4xf32, #tpu.memory_space<vmem>>, %arg1: memref<128x128xf32, #tpu.memory_space<vmem>>, %arg2: memref<4x96xf32, #tpu.memory_space<vmem>>, %arg3: memref<1x96xf32, #tpu.memory_space<vmem>>, %arg4: memref<32x64xf32, #tpu.memory_space<vmem>>, %arg5: memref<32x32xf32, #tpu.memory_space<vmem>>, %arg6: memref<32x128xf32, #tpu.memory_space<vmem>>, %arg7: memref<1x128xf32, #tpu.memory_space<vmem>>, %arg8: memref<2x128xf32, #tpu.memory_space<vmem>>, %arg9: memref<8x16x96xf32, #tpu.memory_space<vmem>>) attributes {dimension_semantics = [], scalar_prefetch = 0 : i64, scratch_operands = 1 : i64, tpu.core_type = #tpu.core_type<tc>} {
    %c0 = arith.constant 0 : index
    %c0_0 = arith.constant 0 : index
    %0 = vector.load %arg4[%c0, %c0_0] : memref<32x64xf32, #tpu.memory_space<vmem>>, vector<32x64xf32>
    %c0_1 = arith.constant 0 : index
    %c0_2 = arith.constant 0 : index
    %1 = vector.load %arg5[%c0_1, %c0_2] : memref<32x32xf32, #tpu.memory_space<vmem>>, vector<32x32xf32>
    %c0_3 = arith.constant 0 : index
    %c0_4 = arith.constant 0 : index
    %2 = vector.load %arg0[%c0_3, %c0_4] : memref<128x4xf32, #tpu.memory_space<vmem>>, vector<128x4xf32>
    %c0_5 = arith.constant 0 : index
    %c0_6 = arith.constant 0 : index
    %3 = vector.load %arg2[%c0_5, %c0_6] : memref<4x96xf32, #tpu.memory_space<vmem>>, vector<4x96xf32>
    %cst = arith.constant dense<0.000000e+00> : vector<128x96xf32>
    %4 = tpu.matmul %2, %3, %cst {dimension_numbers = #tpu.dot_dimension_numbers<[1], [0], [0], [1], [0, 0, 1, 1], [], []>} : vector<128x4xf32>, vector<4x96xf32>, vector<128x96xf32> -> vector<128x96xf32>
    %c0_7 = arith.constant 0 : index
    %c0_8 = arith.constant 0 : index
    %5 = vector.load %arg1[%c0_7, %c0_8] : memref<128x128xf32, #tpu.memory_space<vmem>>, vector<128x128xf32>
    %cst_9 = arith.constant dense<0.000000e+00> : vector<128x96xf32>
    %6 = tpu.matmul %5, %4, %cst_9 {dimension_numbers = #tpu.dot_dimension_numbers<[1], [0], [0], [1], [0, 0, 1, 1], [], []>} : vector<128x128xf32>, vector<128x96xf32>, vector<128x96xf32> -> vector<128x96xf32>
    %c0_10 = arith.constant 0 : index
    %c0_11 = arith.constant 0 : index
    %7 = vector.load %arg3[%c0_10, %c0_11] : memref<1x96xf32, #tpu.memory_space<vmem>>, vector<1x96xf32>
    %8 = vector.broadcast %7 : vector<1x96xf32> to vector<128x96xf32>
    %9 = arith.addf %6, %8 : vector<128x96xf32>
    %10 = vector.shape_cast %9 : vector<128x96xf32> to vector<8x16x96xf32>
    %c0_12 = arith.constant 0 : index
    %c0_13 = arith.constant 0 : index
    %c0_14 = arith.constant 0 : index
    %11 = vector.load %arg9[%c0_12, %c0_13, %c0_14] : memref<8x16x96xf32, #tpu.memory_space<vmem>>, vector<8x16x96xf32>
    tpu.vector_store %arg9[%c0_12, %c0_13, %c0_14], %10 {strides = array<i32>} : memref<8x16x96xf32, #tpu.memory_space<vmem>>, vector<8x16x96xf32>,
    %cst_15 = arith.constant 0.000000e+00 : f32
    %12 = vector.broadcast %cst_15 : f32 to vector<16x32xf32>
    %c0_i32 = arith.constant 0 : i32
    %13 = arith.index_cast %c0_i32 : i32 to index
    %c0_16 = arith.constant 0 : index
    %c0_17 = arith.constant 0 : index
    %14 = vector.load %arg9[%13, %c0_16, %c0_17] : memref<8x16x96xf32, #tpu.memory_space<vmem>>, vector<1x16x96xf32>
    %15 = vector.shape_cast %14 : vector<1x16x96xf32> to vector<16x96xf32>
    %cst_18 = arith.constant dense<0.000000e+00> : vector<16x64xf32>
    %16 = tpu.matmul %12, %0, %cst_18 {dimension_numbers = #tpu.dot_dimension_numbers<[1], [0], [0], [1], [0, 0, 1, 1], [], []>} : vector<16x32xf32>, vector<32x64xf32>, vector<16x64xf32> -> vector<16x64xf32>
    %17 = vector.extract_strided_slice %15 {offsets = [0, 0], sizes = [16, 64], strides = [1, 1]} : vector<16x96xf32> to vector<16x64xf32>
    %18 = arith.addf %17, %16 : vector<16x64xf32>
    %19 = arith.negf %18 : vector<16x64xf32>
    %20 = math.exp %19 : vector<16x64xf32>
    %cst_19 = arith.constant 1.000000e+00 : f32
    %21 = vector.broadcast %cst_19 : f32 to vector<16x64xf32>
    %22 = arith.addf %21, %20 : vector<16x64xf32>
    %23 = arith.divf %21, %22 : vector<16x64xf32>
    %24 = vector.extract_strided_slice %23 {offsets = [0, 0], sizes = [16, 32], strides = [1, 1]} : vector<16x64xf32> to vector<16x32xf32>
    %25 = vector.extract_strided_slice %23 {offsets = [0, 32], sizes = [16, 32], strides = [1, 1]} : vector<16x64xf32> to vector<16x32xf32>
    %26 = vector.extract_strided_slice %15 {offsets = [0, 64], sizes = [16, 32], strides = [1, 1]} : vector<16x96xf32> to vector<16x32xf32>
    %27 = arith.mulf %12, %25 : vector<16x32xf32>
    %cst_20 = arith.constant dense<0.000000e+00> : vector<16x32xf32>
    %28 = tpu.matmul %27, %1, %cst_20 {dimension_numbers = #tpu.dot_dimension_numbers<[1], [0], [0], [1], [0, 0, 1, 1], [], []>} : vector<16x32xf32>, vector<32x32xf32>, vector<16x32xf32> -> vector<16x32xf32>
    %29 = arith.addf %26, %28 : vector<16x32xf32>
    %30 = math.tanh %29 : vector<16x32xf32>
    %31 = arith.mulf %24, %12 : vector<16x32xf32>
    %cst_21 = arith.constant 1.000000e+00 : f32
    %32 = vector.broadcast %cst_21 : f32 to vector<16x32xf32>
    %33 = arith.subf %32, %24 : vector<16x32xf32>
    %34 = arith.mulf %33, %30 : vector<16x32xf32>
    %35 = arith.addf %31, %34 : vector<16x32xf32>
    %c1_i32 = arith.constant 1 : i32
    %36 = arith.index_cast %c1_i32 : i32 to index
    %c0_22 = arith.constant 0 : index
    %c0_23 = arith.constant 0 : index
    %37 = vector.load %arg9[%36, %c0_22, %c0_23] : memref<8x16x96xf32, #tpu.memory_space<vmem>>, vector<1x16x96xf32>
    %38 = vector.shape_cast %37 : vector<1x16x96xf32> to vector<16x96xf32>
    %cst_24 = arith.constant dense<0.000000e+00> : vector<16x64xf32>
    %39 = tpu.matmul %35, %0, %cst_24 {dimension_numbers = #tpu.dot_dimension_numbers<[1], [0], [0], [1], [0, 0, 1, 1], [], []>} : vector<16x32xf32>, vector<32x64xf32>, vector<16x64xf32> -> vector<16x64xf32>
    %40 = vector.extract_strided_slice %38 {offsets = [0, 0], sizes = [16, 64], strides = [1, 1]} : vector<16x96xf32> to vector<16x64xf32>
    %41 = arith.addf %40, %39 : vector<16x64xf32>
    %42 = arith.negf %41 : vector<16x64xf32>
    %43 = math.exp %42 : vector<16x64xf32>
    %cst_25 = arith.constant 1.000000e+00 : f32
    %44 = vector.broadcast %cst_25 : f32 to vector<16x64xf32>
    %45 = arith.addf %44, %43 : vector<16x64xf32>
    %46 = arith.divf %44, %45 : vector<16x64xf32>
    %47 = vector.extract_strided_slice %46 {offsets = [0, 0], sizes = [16, 32], strides = [1, 1]} : vector<16x64xf32> to vector<16x32xf32>
    %48 = vector.extract_strided_slice %46 {offsets = [0, 32], sizes = [16, 32], strides = [1, 1]} : vector<16x64xf32> to vector<16x32xf32>
    %49 = vector.extract_strided_slice %38 {offsets = [0, 64], sizes = [16, 32], strides = [1, 1]} : vector<16x96xf32> to vector<16x32xf32>
    %50 = arith.mulf %35, %48 : vector<16x32xf32>
    %cst_26 = arith.constant dense<0.000000e+00> : vector<16x32xf32>
    %51 = tpu.matmul %50, %1, %cst_26 {dimension_numbers = #tpu.dot_dimension_numbers<[1], [0], [0], [1], [0, 0, 1, 1], [], []>} : vector<16x32xf32>, vector<32x32xf32>, vector<16x32xf32> -> vector<16x32xf32>
    %52 = arith.addf %49, %51 : vector<16x32xf32>
    %53 = math.tanh %52 : vector<16x32xf32>
    %54 = arith.mulf %47, %35 : vector<16x32xf32>
    %cst_27 = arith.constant 1.000000e+00 : f32
    %55 = vector.broadcast %cst_27 : f32 to vector<16x32xf32>
    %56 = arith.subf %55, %47 : vector<16x32xf32>
    %57 = arith.mulf %56, %53 : vector<16x32xf32>
    %58 = arith.addf %54, %57 : vector<16x32xf32>
    %c2_i32 = arith.constant 2 : i32
    %59 = arith.index_cast %c2_i32 : i32 to index
    %c0_28 = arith.constant 0 : index
    %c0_29 = arith.constant 0 : index
    %60 = vector.load %arg9[%59, %c0_28, %c0_29] : memref<8x16x96xf32, #tpu.memory_space<vmem>>, vector<1x16x96xf32>
    %61 = vector.shape_cast %60 : vector<1x16x96xf32> to vector<16x96xf32>
    %cst_30 = arith.constant dense<0.000000e+00> : vector<16x64xf32>
    %62 = tpu.matmul %58, %0, %cst_30 {dimension_numbers = #tpu.dot_dimension_numbers<[1], [0], [0], [1], [0, 0, 1, 1], [], []>} : vector<16x32xf32>, vector<32x64xf32>, vector<16x64xf32> -> vector<16x64xf32>
    %63 = vector.extract_strided_slice %61 {offsets = [0, 0], sizes = [16, 64], strides = [1, 1]} : vector<16x96xf32> to vector<16x64xf32>
    %64 = arith.addf %63, %62 : vector<16x64xf32>
    %65 = arith.negf %64 : vector<16x64xf32>
    %66 = math.exp %65 : vector<16x64xf32>
    %cst_31 = arith.constant 1.000000e+00 : f32
    %67 = vector.broadcast %cst_31 : f32 to vector<16x64xf32>
    %68 = arith.addf %67, %66 : vector<16x64xf32>
    %69 = arith.divf %67, %68 : vector<16x64xf32>
    %70 = vector.extract_strided_slice %69 {offsets = [0, 0], sizes = [16, 32], strides = [1, 1]} : vector<16x64xf32> to vector<16x32xf32>
    %71 = vector.extract_strided_slice %69 {offsets = [0, 32], sizes = [16, 32], strides = [1, 1]} : vector<16x64xf32> to vector<16x32xf32>
    %72 = vector.extract_strided_slice %61 {offsets = [0, 64], sizes = [16, 32], strides = [1, 1]} : vector<16x96xf32> to vector<16x32xf32>
    %73 = arith.mulf %58, %71 : vector<16x32xf32>
    %cst_32 = arith.constant dense<0.000000e+00> : vector<16x32xf32>
    %74 = tpu.matmul %73, %1, %cst_32 {dimension_numbers = #tpu.dot_dimension_numbers<[1], [0], [0], [1], [0, 0, 1, 1], [], []>} : vector<16x32xf32>, vector<32x32xf32>, vector<16x32xf32> -> vector<16x32xf32>
    %75 = arith.addf %72, %74 : vector<16x32xf32>
    %76 = math.tanh %75 : vector<16x32xf32>
    %77 = arith.mulf %70, %58 : vector<16x32xf32>
    %cst_33 = arith.constant 1.000000e+00 : f32
    %78 = vector.broadcast %cst_33 : f32 to vector<16x32xf32>
    %79 = arith.subf %78, %70 : vector<16x32xf32>
    %80 = arith.mulf %79, %76 : vector<16x32xf32>
    %81 = arith.addf %77, %80 : vector<16x32xf32>
    %c3_i32 = arith.constant 3 : i32
    %82 = arith.index_cast %c3_i32 : i32 to index
    %c0_34 = arith.constant 0 : index
    %c0_35 = arith.constant 0 : index
    %83 = vector.load %arg9[%82, %c0_34, %c0_35] : memref<8x16x96xf32, #tpu.memory_space<vmem>>, vector<1x16x96xf32>
    %84 = vector.shape_cast %83 : vector<1x16x96xf32> to vector<16x96xf32>
    %cst_36 = arith.constant dense<0.000000e+00> : vector<16x64xf32>
    %85 = tpu.matmul %81, %0, %cst_36 {dimension_numbers = #tpu.dot_dimension_numbers<[1], [0], [0], [1], [0, 0, 1, 1], [], []>} : vector<16x32xf32>, vector<32x64xf32>, vector<16x64xf32> -> vector<16x64xf32>
    %86 = vector.extract_strided_slice %84 {offsets = [0, 0], sizes = [16, 64], strides = [1, 1]} : vector<16x96xf32> to vector<16x64xf32>
    %87 = arith.addf %86, %85 : vector<16x64xf32>
    %88 = arith.negf %87 : vector<16x64xf32>
    %89 = math.exp %88 : vector<16x64xf32>
    %cst_37 = arith.constant 1.000000e+00 : f32
    %90 = vector.broadcast %cst_37 : f32 to vector<16x64xf32>
    %91 = arith.addf %90, %89 : vector<16x64xf32>
    %92 = arith.divf %90, %91 : vector<16x64xf32>
    %93 = vector.extract_strided_slice %92 {offsets = [0, 0], sizes = [16, 32], strides = [1, 1]} : vector<16x64xf32> to vector<16x32xf32>
    %94 = vector.extract_strided_slice %92 {offsets = [0, 32], sizes = [16, 32], strides = [1, 1]} : vector<16x64xf32> to vector<16x32xf32>
    %95 = vector.extract_strided_slice %84 {offsets = [0, 64], sizes = [16, 32], strides = [1, 1]} : vector<16x96xf32> to vector<16x32xf32>
    %96 = arith.mulf %81, %94 : vector<16x32xf32>
    %cst_38 = arith.constant dense<0.000000e+00> : vector<16x32xf32>
    %97 = tpu.matmul %96, %1, %cst_38 {dimension_numbers = #tpu.dot_dimension_numbers<[1], [0], [0], [1], [0, 0, 1, 1], [], []>} : vector<16x32xf32>, vector<32x32xf32>, vector<16x32xf32> -> vector<16x32xf32>
    %98 = arith.addf %95, %97 : vector<16x32xf32>
    %99 = math.tanh %98 : vector<16x32xf32>
    %100 = arith.mulf %93, %81 : vector<16x32xf32>
    %cst_39 = arith.constant 1.000000e+00 : f32
    %101 = vector.broadcast %cst_39 : f32 to vector<16x32xf32>
    %102 = arith.subf %101, %93 : vector<16x32xf32>
    %103 = arith.mulf %102, %99 : vector<16x32xf32>
    %104 = arith.addf %100, %103 : vector<16x32xf32>
    %c4_i32 = arith.constant 4 : i32
    %105 = arith.index_cast %c4_i32 : i32 to index
    %c0_40 = arith.constant 0 : index
    %c0_41 = arith.constant 0 : index
    %106 = vector.load %arg9[%105, %c0_40, %c0_41] : memref<8x16x96xf32, #tpu.memory_space<vmem>>, vector<1x16x96xf32>
    %107 = vector.shape_cast %106 : vector<1x16x96xf32> to vector<16x96xf32>
    %cst_42 = arith.constant dense<0.000000e+00> : vector<16x64xf32>
    %108 = tpu.matmul %104, %0, %cst_42 {dimension_numbers = #tpu.dot_dimension_numbers<[1], [0], [0], [1], [0, 0, 1, 1], [], []>} : vector<16x32xf32>, vector<32x64xf32>, vector<16x64xf32> -> vector<16x64xf32>
    %109 = vector.extract_strided_slice %107 {offsets = [0, 0], sizes = [16, 64], strides = [1, 1]} : vector<16x96xf32> to vector<16x64xf32>
    %110 = arith.addf %109, %108 : vector<16x64xf32>
    %111 = arith.negf %110 : vector<16x64xf32>
    %112 = math.exp %111 : vector<16x64xf32>
    %cst_43 = arith.constant 1.000000e+00 : f32
    %113 = vector.broadcast %cst_43 : f32 to vector<16x64xf32>
    %114 = arith.addf %113, %112 : vector<16x64xf32>
    %115 = arith.divf %113, %114 : vector<16x64xf32>
    %116 = vector.extract_strided_slice %115 {offsets = [0, 0], sizes = [16, 32], strides = [1, 1]} : vector<16x64xf32> to vector<16x32xf32>
    %117 = vector.extract_strided_slice %115 {offsets = [0, 32], sizes = [16, 32], strides = [1, 1]} : vector<16x64xf32> to vector<16x32xf32>
    %118 = vector.extract_strided_slice %107 {offsets = [0, 64], sizes = [16, 32], strides = [1, 1]} : vector<16x96xf32> to vector<16x32xf32>
    %119 = arith.mulf %104, %117 : vector<16x32xf32>
    %cst_44 = arith.constant dense<0.000000e+00> : vector<16x32xf32>
    %120 = tpu.matmul %119, %1, %cst_44 {dimension_numbers = #tpu.dot_dimension_numbers<[1], [0], [0], [1], [0, 0, 1, 1], [], []>} : vector<16x32xf32>, vector<32x32xf32>, vector<16x32xf32> -> vector<16x32xf32>
    %121 = arith.addf %118, %120 : vector<16x32xf32>
    %122 = math.tanh %121 : vector<16x32xf32>
    %123 = arith.mulf %116, %104 : vector<16x32xf32>
    %cst_45 = arith.constant 1.000000e+00 : f32
    %124 = vector.broadcast %cst_45 : f32 to vector<16x32xf32>
    %125 = arith.subf %124, %116 : vector<16x32xf32>
    %126 = arith.mulf %125, %122 : vector<16x32xf32>
    %127 = arith.addf %123, %126 : vector<16x32xf32>
    %c5_i32 = arith.constant 5 : i32
    %128 = arith.index_cast %c5_i32 : i32 to index
    %c0_46 = arith.constant 0 : index
    %c0_47 = arith.constant 0 : index
    %129 = vector.load %arg9[%128, %c0_46, %c0_47] : memref<8x16x96xf32, #tpu.memory_space<vmem>>, vector<1x16x96xf32>
    %130 = vector.shape_cast %129 : vector<1x16x96xf32> to vector<16x96xf32>
    %cst_48 = arith.constant dense<0.000000e+00> : vector<16x64xf32>
    %131 = tpu.matmul %127, %0, %cst_48 {dimension_numbers = #tpu.dot_dimension_numbers<[1], [0], [0], [1], [0, 0, 1, 1], [], []>} : vector<16x32xf32>, vector<32x64xf32>, vector<16x64xf32> -> vector<16x64xf32>
    %132 = vector.extract_strided_slice %130 {offsets = [0, 0], sizes = [16, 64], strides = [1, 1]} : vector<16x96xf32> to vector<16x64xf32>
    %133 = arith.addf %132, %131 : vector<16x64xf32>
    %134 = arith.negf %133 : vector<16x64xf32>
    %135 = math.exp %134 : vector<16x64xf32>
    %cst_49 = arith.constant 1.000000e+00 : f32
    %136 = vector.broadcast %cst_49 : f32 to vector<16x64xf32>
    %137 = arith.addf %136, %135 : vector<16x64xf32>
    %138 = arith.divf %136, %137 : vector<16x64xf32>
    %139 = vector.extract_strided_slice %138 {offsets = [0, 0], sizes = [16, 32], strides = [1, 1]} : vector<16x64xf32> to vector<16x32xf32>
    %140 = vector.extract_strided_slice %138 {offsets = [0, 32], sizes = [16, 32], strides = [1, 1]} : vector<16x64xf32> to vector<16x32xf32>
    %141 = vector.extract_strided_slice %130 {offsets = [0, 64], sizes = [16, 32], strides = [1, 1]} : vector<16x96xf32> to vector<16x32xf32>
    %142 = arith.mulf %127, %140 : vector<16x32xf32>
    %cst_50 = arith.constant dense<0.000000e+00> : vector<16x32xf32>
    %143 = tpu.matmul %142, %1, %cst_50 {dimension_numbers = #tpu.dot_dimension_numbers<[1], [0], [0], [1], [0, 0, 1, 1], [], []>} : vector<16x32xf32>, vector<32x32xf32>, vector<16x32xf32> -> vector<16x32xf32>
    %144 = arith.addf %141, %143 : vector<16x32xf32>
    %145 = math.tanh %144 : vector<16x32xf32>
    %146 = arith.mulf %139, %127 : vector<16x32xf32>
    %cst_51 = arith.constant 1.000000e+00 : f32
    %147 = vector.broadcast %cst_51 : f32 to vector<16x32xf32>
    %148 = arith.subf %147, %139 : vector<16x32xf32>
    %149 = arith.mulf %148, %145 : vector<16x32xf32>
    %150 = arith.addf %146, %149 : vector<16x32xf32>
    %c6_i32 = arith.constant 6 : i32
    %151 = arith.index_cast %c6_i32 : i32 to index
    %c0_52 = arith.constant 0 : index
    %c0_53 = arith.constant 0 : index
    %152 = vector.load %arg9[%151, %c0_52, %c0_53] : memref<8x16x96xf32, #tpu.memory_space<vmem>>, vector<1x16x96xf32>
    %153 = vector.shape_cast %152 : vector<1x16x96xf32> to vector<16x96xf32>
    %cst_54 = arith.constant dense<0.000000e+00> : vector<16x64xf32>
    %154 = tpu.matmul %150, %0, %cst_54 {dimension_numbers = #tpu.dot_dimension_numbers<[1], [0], [0], [1], [0, 0, 1, 1], [], []>} : vector<16x32xf32>, vector<32x64xf32>, vector<16x64xf32> -> vector<16x64xf32>
    %155 = vector.extract_strided_slice %153 {offsets = [0, 0], sizes = [16, 64], strides = [1, 1]} : vector<16x96xf32> to vector<16x64xf32>
    %156 = arith.addf %155, %154 : vector<16x64xf32>
    %157 = arith.negf %156 : vector<16x64xf32>
    %158 = math.exp %157 : vector<16x64xf32>
    %cst_55 = arith.constant 1.000000e+00 : f32
    %159 = vector.broadcast %cst_55 : f32 to vector<16x64xf32>
    %160 = arith.addf %159, %158 : vector<16x64xf32>
    %161 = arith.divf %159, %160 : vector<16x64xf32>
    %162 = vector.extract_strided_slice %161 {offsets = [0, 0], sizes = [16, 32], strides = [1, 1]} : vector<16x64xf32> to vector<16x32xf32>
    %163 = vector.extract_strided_slice %161 {offsets = [0, 32], sizes = [16, 32], strides = [1, 1]} : vector<16x64xf32> to vector<16x32xf32>
    %164 = vector.extract_strided_slice %153 {offsets = [0, 64], sizes = [16, 32], strides = [1, 1]} : vector<16x96xf32> to vector<16x32xf32>
    %165 = arith.mulf %150, %163 : vector<16x32xf32>
    %cst_56 = arith.constant dense<0.000000e+00> : vector<16x32xf32>
    %166 = tpu.matmul %165, %1, %cst_56 {dimension_numbers = #tpu.dot_dimension_numbers<[1], [0], [0], [1], [0, 0, 1, 1], [], []>} : vector<16x32xf32>, vector<32x32xf32>, vector<16x32xf32> -> vector<16x32xf32>
    %167 = arith.addf %164, %166 : vector<16x32xf32>
    %168 = math.tanh %167 : vector<16x32xf32>
    %169 = arith.mulf %162, %150 : vector<16x32xf32>
    %cst_57 = arith.constant 1.000000e+00 : f32
    %170 = vector.broadcast %cst_57 : f32 to vector<16x32xf32>
    %171 = arith.subf %170, %162 : vector<16x32xf32>
    %172 = arith.mulf %171, %168 : vector<16x32xf32>
    %173 = arith.addf %169, %172 : vector<16x32xf32>
    %c7_i32 = arith.constant 7 : i32
    %174 = arith.index_cast %c7_i32 : i32 to index
    %c0_58 = arith.constant 0 : index
    %c0_59 = arith.constant 0 : index
    %175 = vector.load %arg9[%174, %c0_58, %c0_59] : memref<8x16x96xf32, #tpu.memory_space<vmem>>, vector<1x16x96xf32>
    %176 = vector.shape_cast %175 : vector<1x16x96xf32> to vector<16x96xf32>
    %cst_60 = arith.constant dense<0.000000e+00> : vector<16x64xf32>
    %177 = tpu.matmul %173, %0, %cst_60 {dimension_numbers = #tpu.dot_dimension_numbers<[1], [0], [0], [1], [0, 0, 1, 1], [], []>} : vector<16x32xf32>, vector<32x64xf32>, vector<16x64xf32> -> vector<16x64xf32>
    %178 = vector.extract_strided_slice %176 {offsets = [0, 0], sizes = [16, 64], strides = [1, 1]} : vector<16x96xf32> to vector<16x64xf32>
    %179 = arith.addf %178, %177 : vector<16x64xf32>
    %180 = arith.negf %179 : vector<16x64xf32>
    %181 = math.exp %180 : vector<16x64xf32>
    %cst_61 = arith.constant 1.000000e+00 : f32
    %182 = vector.broadcast %cst_61 : f32 to vector<16x64xf32>
    %183 = arith.addf %182, %181 : vector<16x64xf32>
    %184 = arith.divf %182, %183 : vector<16x64xf32>
    %185 = vector.extract_strided_slice %184 {offsets = [0, 0], sizes = [16, 32], strides = [1, 1]} : vector<16x64xf32> to vector<16x32xf32>
    %186 = vector.extract_strided_slice %184 {offsets = [0, 32], sizes = [16, 32], strides = [1, 1]} : vector<16x64xf32> to vector<16x32xf32>
    %187 = vector.extract_strided_slice %176 {offsets = [0, 64], sizes = [16, 32], strides = [1, 1]} : vector<16x96xf32> to vector<16x32xf32>
    %188 = arith.mulf %173, %186 : vector<16x32xf32>
    %cst_62 = arith.constant dense<0.000000e+00> : vector<16x32xf32>
    %189 = tpu.matmul %188, %1, %cst_62 {dimension_numbers = #tpu.dot_dimension_numbers<[1], [0], [0], [1], [0, 0, 1, 1], [], []>} : vector<16x32xf32>, vector<32x32xf32>, vector<16x32xf32> -> vector<16x32xf32>
    %190 = arith.addf %187, %189 : vector<16x32xf32>
    %191 = math.tanh %190 : vector<16x32xf32>
    %192 = arith.mulf %185, %173 : vector<16x32xf32>
    %cst_63 = arith.constant 1.000000e+00 : f32
    %193 = vector.broadcast %cst_63 : f32 to vector<16x32xf32>
    %194 = arith.subf %193, %185 : vector<16x32xf32>
    %195 = arith.mulf %194, %191 : vector<16x32xf32>
    %196 = arith.addf %192, %195 : vector<16x32xf32>
    %c8_i32 = arith.constant 8 : i32
    %cst_64 = arith.constant 0.000000e+00 : f32
    %197 = vector.broadcast %cst_64 : f32 to vector<16x32xf32>
    %198 = arith.maximumf %196, %197 : vector<16x32xf32>
    %199 = vector.shape_cast %198 : vector<16x32xf32> to vector<2x8x32xf32>
    %cst_65 = arith.constant dense<0.000000e+00> : vector<2x32xf32>
    %200 = vector.multi_reduction <add>, %199, %cst_65 [1] : vector<2x8x32xf32> to vector<2x32xf32>
    %cst_66 = arith.constant 8.000000e+00 : f32
    %201 = vector.broadcast %cst_66 : f32 to vector<2x32xf32>
    %202 = arith.divf %200, %201 : vector<2x32xf32>
    %c0_67 = arith.constant 0 : index
    %c0_68 = arith.constant 0 : index
    %203 = vector.load %arg6[%c0_67, %c0_68] : memref<32x128xf32, #tpu.memory_space<vmem>>, vector<32x128xf32>
    %cst_69 = arith.constant dense<0.000000e+00> : vector<2x128xf32>
    %204 = tpu.matmul %202, %203, %cst_69 {dimension_numbers = #tpu.dot_dimension_numbers<[1], [0], [0], [1], [0, 0, 1, 1], [], []>} : vector<2x32xf32>, vector<32x128xf32>, vector<2x128xf32> -> vector<2x128xf32>
    %c0_70 = arith.constant 0 : index
    %c0_71 = arith.constant 0 : index
    %205 = vector.load %arg7[%c0_70, %c0_71] : memref<1x128xf32, #tpu.memory_space<vmem>>, vector<1x128xf32>
    %206 = vector.broadcast %205 : vector<1x128xf32> to vector<2x128xf32>
    %207 = arith.addf %204, %206 : vector<2x128xf32>
    %c0_72 = arith.constant 0 : index
    %c0_73 = arith.constant 0 : index
    %208 = vector.load %arg8[%c0_72, %c0_73] : memref<2x128xf32, #tpu.memory_space<vmem>>, vector<2x128xf32>
    tpu.vector_store %arg8[%c0_72, %c0_73], %207 {strides = array<i32>} : memref<2x128xf32, #tpu.memory_space<vmem>>, vector<2x128xf32>,
    return
  }
}

</mosaic_0001>

<bundles_post_ra>
// kernel: tpu_custom_call.1
= control target key start
LH: loop header
LB: loop body
LE: loop exit
PB: predicated region body
PF: predicated region fallthrough
CT: control target
= control target key end

     0   :  { %13 = vsyncpa [#allocation4], 0  ;;  %s3647_s0 = inlined_call_operand.vmem [shape: f32[128,4], index: 0, kind: input, shape index: {}]   ;;  %s3648_s1 = inlined_call_operand.vmem [shape: f32[128,128], index: 1, kind: input, shape index: {}]   ;;  %s3649_s2 = inlined_call_operand.vmem [shape: f32[4,96], index: 2, kind: input, shape index: {}]   ;;  %s3650_s3 = inlined_call_operand.vmem [shape: f32[1,96], index: 3, kind: input, shape index: {}]   ;;  %s3651_s4 = inlined_call_operand.hbm [shape: f32[32,64], index: 4, kind: input, shape index: {}]   ;;  %s3652_s5 = inlined_call_operand.hbm [shape: f32[32,32], index: 5, kind: input, shape index: {}]   ;;  %s3653_s6 = inlined_call_operand.hbm [shape: f32[32,128], index: 6, kind: input, shape index: {}]   ;;  %s3654_s7 = inlined_call_operand.vmem [shape: f32[1,128], index: 7, kind: input, shape index: {}]   ;;  %s3655_s8 = inlined_call_operand.hbm [shape: f32[2,128], index: 8, kind: output, shape index: {}]  }
   0x1   :  { %14 = vsyncpa [#allocation7], 0 }
   0x2   :  { %15 = vsyncpa [#allocation5], 0  ;;  %s3181_s27 = smov [#allocation6]   ;;  %s3182_s29 = smov [#allocation3]  }
   0x3   :  { %s41_s28 = sshll.u32 %s3181_s27, 4  ;;  %s29_s30 = sshll.u32 %s3182_s29, 4  ;;  %s42_s28 = int_to_ptr.vmem [resolvable:$true] %s41_s28  ;;  %s3237_s30 = int_to_ptr.vmem [resolvable:$true] %s29_s30 }
   0x4   :  { %s3087_s11 = scalar_lea.hbm %s3652_s5, 512 }
   0x5   :  { %p3088_p0 = scmp.ne.s32.totalorder %s3652_s5, %s3087_s11  ;;  %p3091_p1 = scmp.lt.u32.totalorder %s3087_s11, %s3652_s5 }
   0x7   :  { %p3093_p2 = pnand %p3091_p1, %p3088_p0 }
   0x9   :  { %3096 = shalt.err (!%p3093_p2)
}
   0xa   :  { %s3097_s16 = scalar_lea.vmem %s42_s28, 512  ;;  %p3102_p4 = scmp.lt.s32.totalorder %s42_s28, %s42_s28 }
   0xb   :  { %p3098_p3 = scmp.ne.s32.totalorder %s42_s28, %s3097_s16  ;;  %p3103_p5 = scmp.lt.s32.totalorder %s3097_s16, %s3097_s16 }
   0xd   :  { %p3104_p6 = por %p3103_p5, %p3102_p4 }
   0xf   :  { %p3105_p7 = pnand %p3104_p6, %p3098_p3 }
  0x11   :  { %3108 = shalt.err (!%p3105_p7)
}
  0x12   :  { %s3183_s17 = smov 128   ;;  %s3184_s18 = smov 8  }
  0x13   :  { %47 = dma.hbm_to_vmem [thread:$0]  %s3652_s5, 512, %s42_s28, [#allocation7], %s3183_s17, %s3183_s17, %s3184_s18  }
  0x14   :  { %s3109_s23 = scalar_lea.hbm %s3651_s4, 512 }
  0x15   :  { %p3110_p8 = scmp.ne.s32.totalorder %s3651_s4, %s3109_s23  ;;  %p3113_p9 = scmp.lt.u32.totalorder %s3109_s23, %s3651_s4 }
  0x17   :  { %p3115_p10 = pnand %p3113_p9, %p3110_p8 }
  0x19   :  { %3118 = shalt.err (!%p3115_p10)
}
  0x1a   :  { %s3119_s29 = scalar_lea.vmem %s3237_s30, 512  ;;  %p3124_p12 = scmp.lt.s32.totalorder %s3237_s30, %s3237_s30 }
  0x1b   :  { %p3120_p11 = scmp.ne.s32.totalorder %s3237_s30, %s3119_s29  ;;  %p3125_p13 = scmp.lt.s32.totalorder %s3119_s29, %s3119_s29 }
  0x1d   :  { %p3126_p0 = por %p3125_p13, %p3124_p12 }
  0x1f   :  { %p3127_p1 = pnand %p3126_p0, %p3120_p11 }
  0x21   :  { %3130 = shalt.err (!%p3127_p1)
}
  0x22   :  { %35 = dma.hbm_to_vmem [thread:$0]  %s3651_s4, 512, %s3237_s30, [#allocation4], %s3183_s17, %s3183_s17, %s3184_s18  }
  0x23   :  { %s3185_s9 = smov [#allocation8]   ;;  %s3131_s13 = scalar_lea.hbm %s3653_s6, 512 }
  0x24   :  { %s53_s10 = sshll.u32 %s3185_s9, 4  ;;  %p3132_p2 = scmp.ne.s32.totalorder %s3653_s6, %s3131_s13  ;;  %s54_s10 = int_to_ptr.vmem [resolvable:$true] %s53_s10 }
  0x25   :  { %p3135_p3 = scmp.lt.u32.totalorder %s3131_s13, %s3653_s6 }
  0x27   :  { %p3137_p4 = pnand %p3135_p3, %p3132_p2 }
  0x29   :  { %3140 = shalt.err (!%p3137_p4)
}
  0x2a   :  { %s3141_s20 = scalar_lea.vmem %s54_s10, 512  ;;  %p3146_p6 = scmp.lt.s32.totalorder %s54_s10, %s54_s10 }
  0x2b   :  { %p3142_p5 = scmp.ne.s32.totalorder %s54_s10, %s3141_s20  ;;  %p3147_p7 = scmp.lt.s32.totalorder %s3141_s20, %s3141_s20 }
  0x2d   :  { %p3148_p8 = por %p3147_p7, %p3146_p6 }
  0x2f   :  { %p3149_p9 = pnand %p3148_p8, %p3142_p5 }
  0x31   :  { %3152 = shalt.err (!%p3149_p9)
}
  0x32   :  { %59 = dma.hbm_to_vmem [thread:$0]  %s3653_s6, 512, %s54_s10, [#allocation7], %s3183_s17, %s3183_s17, %s3184_s18  }
  0x33   :  { %3175 = dma.done.wait [#allocation4], 512  }
  0x34   :  { %3176 = vsyncadd [#allocation4], 4294966784 }
  0x35   :  { %3177 = dma.done.wait [#allocation7], 1024  }
  0x36   :  { %3178 = vsyncadd [#allocation7], 4294966272  ;;  %vm145_vm0 = vcmask 1043456   ;;  %vm96_vm1 = vcmask 31744   ;;  %v95_v0 = vld [vmem:[%s3649_s2] sm:$0xf] }
  0x37   :  { %v79_v1 = vld [vmem:[%s3647_s0] sm:$0xff]  ;;  %v80_v2 = vld [vmem:[%s3647_s0 + $0x8] sm:$0xff]  ;;  %2545 = vmatprep.subr.msk.mxu0 %vm145_vm0, %v95_v0  ;;  %v81_v3 = vld [vmem:[%s3647_s0 + $0x10] sm:$0xff]  ;;  %v3186_v24 = vmov 0.0   ;;  %vm462_vm2 = vcmask 785408   ;;  %vm481_vm3 = vcmask 261120  }
  0x38   :  { %2547 = vmatprep.mubr.msk.f32.mxu0 %vm96_vm1, %v79_v1  ;;  %2546 = vmatpush3.msk.msra.mxu0 %vm145_vm0, %v95_v0  ;;  %v82_v4 = vld [vmem:[%s3647_s0 + $0x18] sm:$0xff]  ;;  %v83_v5 = vld [vmem:[%s3647_s0 + $0x20] sm:$0xff]  ;;  %v84_v6 = vld [vmem:[%s3647_s0 + $0x28] sm:$0xff]  ;;  %s3188_s28 = smov 64   ;;  %vm3190_vm4 = vmmov 0   ;;  %vm2238_vm5 = vcmask 1041409  }
  0x39   :  { %2548 = vmatmul.mubr.msk.f32.vlgmr.msra.gmra.mrb[0].mxu0 %vm96_vm1, %v80_v2  ;;  %v85_v7 = vld [vmem:[%s3647_s0 + $0x30] sm:$0xff]  ;;  %v86_v8 = vld [vmem:[%s3647_s0 + $0x38] sm:$0xff]  ;;  %v87_v9 = vld [vmem:[%s3647_s0 + $0x40] sm:$0xff] }
  0x3a   :  { %2550 = vmatprep.mubr.msk.f32.mxu0 %vm96_vm1, %v81_v3  ;;  %v88_v10 = vld [vmem:[%s3647_s0 + $0x48] sm:$0xff]  ;;  %v89_v11 = vld [vmem:[%s3647_s0 + $0x50] sm:$0xff]  ;;  %v90_v12 = vld [vmem:[%s3647_s0 + $0x58] sm:$0xff] }
  0x3b   :  { %v91_v13 = vld [vmem:[%s3647_s0 + $0x60] sm:$0xff]  ;;  %v92_v14 = vld [vmem:[%s3647_s0 + $0x68] sm:$0xff]  ;;  %v93_v15 = vld [vmem:[%s3647_s0 + $0x70] sm:$0xff] }
  0x3c   :  { %v94_v16 = vld [vmem:[%s3647_s0 + $0x78] sm:$0xff]  ;;  %v71_v17 = vld [vmem:[#allocation3] sm:$0xff]  ;;  %v72_v18 = vld [vmem:[#allocation3 + $0x8] sm:$0xff] }
  0x3d   :  { %2551 = vmatmul.mubr.msk.f32.gmra.mrb[2].mxu0 %vm96_vm1, %v82_v4  ;;  %v3356_v19 = vpack.c.bf16 %v72_v18, %v71_v17  ;;  %v73_v20 = vld [vmem:[#allocation3 + $0x10] sm:$0xff]  ;;  %v74_v21 = vld [vmem:[#allocation3 + $0x18] sm:$0xff]  ;;  %v294_v23 = vld [vmem:[%s3648_s1] sm:$0xff] }
  0x3e   :  { %2553 = vmatprep.mubr.msk.f32.mxu0 %vm96_vm1, %v83_v5  ;;  %v3360_v22 = vpack.c.bf16 %v74_v21, %v73_v20  ;;  %2603 = vmatprep.mubr.f32.mxu1 %v294_v23  ;;  %v295_v49 = vld [vmem:[%s3648_s1 + $0x8] sm:$0xff]  ;;  %v75_v52 = vld [vmem:[#allocation6] sm:$0xff]  ;;  %v77_v4 = vld [vmem:[#allocation6 + $0x10] sm:$0xff] }
  0x3f   :  { %2847 = vmatprep.subr.bf16.mxu0 %v3356_v19  ;;  %v76_v53 = vld [vmem:[#allocation6 + $0x8] sm:$0xff]  ;;  %v3384_v55 = vld [vmem:[%s3650_s3] ss:$0 sm:$0xff]  ;;  %v78_v5 = vld [vmem:[#allocation6 + $0x18] sm:$0xff]  ;;  %s3187_s3 = smov 96  }
  0x40   :  { %2849 = vmatpush3.bf16.msra.mxu0 %v3356_v19  ;;  %v3377_v54 = vpack.c.bf16 %v76_v53, %v75_v52  ;;  %v296_v17 = vld [vmem:[%s3648_s1 + $0x10] sm:$0xff]  ;;  %v297_v18 = vld [vmem:[%s3648_s1 + $0x18] sm:$0xff] }
  0x41   :  { %2554 = vmatmul.mubr.msk.f32.gmra.mrb[4].mxu0 %vm96_vm1, %v84_v6  ;;  %2851 = vmatprep.subr.bf16.mxu0 %v3360_v22 }
  0x42   :  { %2556 = vmatprep.mubr.msk.f32.mxu0 %vm96_vm1, %v85_v7 }
  0x44   :  { %2853 = vmatpush3.bf16.msra.mxu0 %v3360_v22 }
  0x45   :  { %2557 = vmatmul.mubr.msk.f32.gmra.mrb[6].mxu0 %vm96_vm1, %v86_v8  ;;  %2855 = vmatprep.subr.bf16.mxu0 %v3377_v54  ;;  %v3390_v8 = vpack.c.bf16 %v78_v5, %v77_v4  ;;  %v304_v4 = vld [vmem:[%s3648_s1 + $0x50] sm:$0xff]  ;;  %v305_v5 = vld [vmem:[%s3648_s1 + $0x58] sm:$0xff] }
  0x46   :  { %2559 = vmatprep.mubr.msk.f32.mxu0 %vm96_vm1, %v87_v9 }
  0x49   :  { %2560 = vmatmul.mubr.msk.f32.gmra.mrb[8].mxu0 %vm96_vm1, %v88_v10 }
  0x4a   :  { %2562 = vmatprep.mubr.msk.f32.mxu0 %vm96_vm1, %v89_v11 }
  0x4d   :  { %2563 = vmatmul.mubr.msk.f32.gmra.mrb[10].mxu0 %vm96_vm1, %v90_v12 }
  0x4e   :  { %2565 = vmatprep.mubr.msk.f32.mxu0 %vm96_vm1, %v91_v13 }
  0x51   :  { %2566 = vmatmul.mubr.msk.f32.gmra.mrb[12].mxu0 %vm96_vm1, %v92_v14 }
  0x52   :  { %2568 = vmatprep.mubr.msk.f32.mxu0 %vm96_vm1, %v93_v15 }
  0x55   :  { %2569 = vmatmul.mubr.msk.f32.gmra.mrb[14].mxu0 %vm96_vm1, %v94_v16 }
  0x56   :  { %2635 = vmatprep.mubr.f32.mxu0 %v3186_v24 }
  0x59   :  { %2636 = vmatmul.mubr.f32.vlgmr.msra.gmra.mrb[16].mxu0 %v3186_v24 }
  0x5a   :  { %2857 = vmatpush3.bf16.msra.mxu0 %v3377_v54 }
  0x5b   :  { %2859 = vmatprep.subr.bf16.mxu0 %v3390_v8 }
  0x5e   :  { %2861 = vmatpush3.bf16.msra.mxu0 %v3390_v8 }
  0x5f   :  { %2863 = vmatprep.subr.bf16.mxu0 %v3356_v19 }
 0x10c   :  { %v2549_v25 = vpop.f32.mrb[0].mxu0 }
 0x10d   :  { %v215_v26 = vpop.f32.mrb[1].mxu0 }
 0x10e   :  { %v2814_v27 = vpack.c.bf16 %v2549_v25, %v215_v26 }
 0x110   :  { %v2552_v28 = vpop.f32.mrb[2].mxu0  ;;  %2815 = vmatprep.subr.bf16.mxu1 %v2814_v27 }
 0x111   :  { %v225_v29 = vpop.f32.mrb[3].mxu0  ;;  %2817 = vmatpush3.bf16.msra.mxu1 %v2814_v27 }
 0x112   :  { %v2818_v30 = vpack.c.bf16 %v2552_v28, %v225_v29 }
 0x114   :  { %v2555_v31 = vpop.f32.mrb[4].mxu0  ;;  %2819 = vmatprep.subr.bf16.mxu1 %v2818_v30 }
 0x115   :  { %v235_v32 = vpop.f32.mrb[5].mxu0  ;;  %2821 = vmatpush3.bf16.msra.mxu1 %v2818_v30 }
 0x116   :  { %v2822_v33 = vpack.c.bf16 %v2555_v31, %v235_v32 }
 0x118   :  { %v2558_v34 = vpop.f32.mrb[6].mxu0  ;;  %2823 = vmatprep.subr.bf16.mxu1 %v2822_v33 }
 0x119   :  { %v245_v35 = vpop.f32.mrb[7].mxu0  ;;  %2825 = vmatpush3.bf16.msra.mxu1 %v2822_v33 }
 0x11a   :  { %v2826_v36 = vpack.c.bf16 %v2558_v34, %v245_v35 }
 0x11c   :  { %v2561_v37 = vpop.f32.mrb[8].mxu0  ;;  %2827 = vmatprep.subr.bf16.mxu1 %v2826_v36 }
 0x11d   :  { %v255_v38 = vpop.f32.mrb[9].mxu0  ;;  %2829 = vmatpush3.bf16.msra.mxu1 %v2826_v36 }
 0x11e   :  { %v2830_v39 = vpack.c.bf16 %v2561_v37, %v255_v38 }
 0x120   :  { %v2564_v40 = vpop.f32.mrb[10].mxu0  ;;  %2831 = vmatprep.subr.bf16.mxu1 %v2830_v39 }
 0x121   :  { %v265_v41 = vpop.f32.mrb[11].mxu0  ;;  %2833 = vmatpush3.bf16.msra.mxu1 %v2830_v39 }
 0x122   :  { %v2834_v42 = vpack.c.bf16 %v2564_v40, %v265_v41 }
 0x124   :  { %v2567_v43 = vpop.f32.mrb[12].mxu0  ;;  %2835 = vmatprep.subr.bf16.mxu1 %v2834_v42 }
 0x125   :  { %v275_v44 = vpop.f32.mrb[13].mxu0  ;;  %2837 = vmatpush3.bf16.msra.mxu1 %v2834_v42 }
 0x126   :  { %v2838_v45 = vpack.c.bf16 %v2567_v43, %v275_v44 }
 0x128   :  { %v2570_v46 = vpop.f32.mrb[14].mxu0  ;;  %2839 = vmatprep.subr.bf16.mxu1 %v2838_v45 }
 0x129   :  { %v285_v47 = vpop.f32.mrb[15].mxu0  ;;  %2841 = vmatpush3.bf16.msra.mxu1 %v2838_v45 }
 0x12a   :  { %v2842_v48 = vpack.c.bf16 %v2570_v46, %v285_v47 }
 0x12c   :  { %2843 = vmatprep.subr.bf16.mxu1 %v2842_v48  ;;  %v2637_v50 = vpop.f32.mrb[16].mxu0 }
 0x12d   :  { %2845 = vmatpush3.bf16.msra.mxu1 %v2842_v48  ;;  %v551_v51 = vpop.f32.mrb[17].mxu0 }
 0x12e   :  { %2879 = vmatprep.subr.bf16.mxu1 %v3356_v19 }
 0x130   :  { %2604 = vmatmul.mubr.f32.vlgmr.msra.gmra.mrb[0].mxu1 %v295_v49 }
 0x131   :  { %2881 = vmatpush3.bf16.msra.mxu1 %v3356_v19  ;;  %2606 = vmatprep.mubr.f32.mxu1 %v296_v17 }
 0x132   :  { %2883 = vmatprep.subr.bf16.mxu1 %v3360_v22 }
 0x134   :  { %2607 = vmatmul.mubr.f32.gmra.mrb[2].mxu1 %v297_v18 }
 0x135   :  { %2885 = vmatpush3.bf16.msra.mxu1 %v3360_v22 }
 0x136   :  { %2895 = vmatprep.subr.bf16.mxu1 %v3356_v19 }
 0x203   :  { %v2605_v56 = vpop.f32.mrb[0].mxu1 }
 0x204   :  { %v389_v57 = vadd.f32 %v2605_v56, %v3384_v55  ;;  %v383_v58 = vpop.f32.mrb[1].mxu1 }
 0x205   :  { %v384_v59 = vadd.f32 %v3384_v55, %v383_v58 }
 0x206   :  { %464 = vst.msk [vmem:[#allocation2 + $0x8] sm:$0xff] %vm462_vm2, %v389_v57 }
 0x207   :  { %463 = vst.msk [vmem:[#allocation2] sm:$0xff] %vm462_vm2, %v384_v59  ;;  %v2608_v28 = vpop.f32.mrb[2].mxu1 }
 0x208   :  { %v399_v29 = vadd.f32 %v2608_v28, %v3384_v55  ;;  %v393_v30 = vpop.f32.mrb[3].mxu1 }
 0x209   :  { %v394_v31 = vadd.f32 %v3384_v55, %v393_v30 }
 0x20a   :  { %466 = vst.msk [vmem:[#allocation2 + $0x18] sm:$0xff] %vm462_vm2, %v399_v29 }
 0x20b   :  { %465 = vst.msk [vmem:[#allocation2 + $0x10] sm:$0xff] %vm462_vm2, %v394_v31 }
 0x20d   :  { %v480_v60 = vld [vmem:[#allocation2 + $0x8] sm:$0xff] }
 0x20e   :  { %v561_v61 = vadd.f32 %v2637_v50, %v480_v60  ;;  %v479_v62 = vld [vmem:[#allocation2] sm:$0xff] }
 0x20f   :  { %v560_v63 = vadd.f32 %v551_v51, %v479_v62 }
 0x210   :  { %v2348_v0 = vmul.f32 -1.442695, %v561_v61 }
 0x211   :  { %v2347_v1 = vmul.f32 -1.442695, %v560_v63  ;;  %v689_v40 = vld [vmem:[#allocation2 + $0x18] sm:$0xff]  ;;  %v299_v63 = vld [vmem:[%s3648_s1 + $0x28] sm:$0xff] }
 0x212   :  { %2991 = vpow2.f32 %v2348_v0  ;;  %v688_v41 = vld [vmem:[#allocation2 + $0x10] sm:$0xff] }
 0x213   :  { %2993 = vpow2.f32 %v2347_v1  ;;  %v300_v0 = vld [vmem:[%s3648_s1 + $0x30] sm:$0xff]  ;;  %v301_v1 = vld [vmem:[%s3648_s1 + $0x38] sm:$0xff] }
 0x21c   :  { %v2992_v2 = vpop.eup %2991 }
 0x21d   :  { %v2994_v3 = vpop.eup %2993  ;;  %v569_v6 = vadd.f32 1.0, %v2992_v2  ;;  %v302_v2 = vld [vmem:[%s3648_s1 + $0x40] sm:$0xff] }
 0x21e   :  { %v568_v7 = vadd.f32 1.0, %v2994_v3  ;;  %v303_v3 = vld [vmem:[%s3648_s1 + $0x48] sm:$0xff] }
 0x220   :  { %2995 = vrcp.f32 %v568_v7  ;;  %v307_v7 = vld [vmem:[%s3648_s1 + $0x68] sm:$0xff] }
 0x221   :  { %2997 = vrcp.f32 %v569_v6  ;;  %v306_v6 = vld [vmem:[%s3648_s1 + $0x60] sm:$0xff] }
 0x22a   :  { %v2996_v9 = vpop.eup %2995 }
 0x22b   :  { %v574_v10 = vmul.f32 0.0, %v2996_v9  ;;  %v2998_v11 = vpop.eup %2997  ;;  %v673_v32 = vsub.f32 1.0, %v2996_v9 }
 0x22c   :  { %v575_v12 = vmul.f32 0.0, %v2998_v11  ;;  %v674_v36 = vsub.f32 1.0, %v2998_v11 }
 0x22d   :  { %578 = vrot.lane.b32.xlu0 %v574_v10, %s3187_s3 }
 0x231   :  { %580 = vrot.lane.b32.xlu0 %v575_v12, %s3187_s3 }
 0x29f   :  { %v579_v13 = vpop.permute.xlu0 %578 }
 0x2a0   :  { %2646 = vmatprep.mubr.msk.f32.mxu0 %vm481_vm3, %v579_v13  ;;  %v309_v13 = vld [vmem:[%s3648_s1 + $0x78] sm:$0xff] }
 0x2a3   :  { %v581_v14 = vpop.permute.xlu0 %580 }
 0x2a4   :  { %2647 = vmatmul.mubr.msk.f32.vlgmr.msra.gmra.mrb[18].mxu0 %vm481_vm3, %v581_v14 }
 0x2a5   :  { %2865 = vmatpush3.bf16.msra.mxu0 %v3356_v19 }
 0x2a6   :  { %2867 = vmatprep.subr.bf16.mxu0 %v3360_v22 }
 0x2a9   :  { %2869 = vmatpush3.bf16.msra.mxu0 %v3360_v22 }
 0x2aa   :  { %2871 = vmatprep.subr.bf16.mxu0 %v3377_v54 }
 0x377   :  { %v2648_v15 = vpop.f32.mrb[18].mxu0 }
 0x378   :  { %v652_v16 = vpop.f32.mrb[19].mxu0 }
 0x379   :  { %663 = vrot.lane.b32.xlu1 %v652_v16, %s3188_s28 }
 0x37d   :  { %665 = vrot.lane.b32.xlu1 %v2648_v15, %s3188_s28 }
 0x3eb   :  { %v664_v20 = vpop.permute.xlu1 %663 }
 0x3ec   :  { %v669_v21 = vadd.f32 %v664_v20, %v479_v62  ;;  %v298_v62 = vld [vmem:[%s3648_s1 + $0x20] sm:$0xff] }
 0x3ed   :  { %2609 = vmatprep.mubr.f32.mxu1 %v298_v62 }
 0x3ee   :  { %2999 = vtanh.f32 %v669_v21  ;;  %2610 = vmatmul.mubr.f32.gmra.mrb[4].mxu1 %v299_v63 }
 0x3ef   :  { %v666_v23 = vpop.permute.xlu1 %665  ;;  %2612 = vmatprep.mubr.f32.mxu1 %v300_v0 }
 0x3f0   :  { %v670_v25 = vadd.f32 %v666_v23, %v480_v60 }
 0x3f2   :  { %3001 = vtanh.f32 %v670_v25  ;;  %2613 = vmatmul.mubr.f32.gmra.mrb[6].mxu1 %v301_v1 }
 0x3f3   :  { %2615 = vmatprep.mubr.f32.mxu1 %v302_v2 }
 0x3f6   :  { %2616 = vmatmul.mubr.f32.gmra.mrb[8].mxu1 %v303_v3 }
 0x3f7   :  { %2618 = vmatprep.mubr.f32.mxu1 %v304_v4 }
 0x3f8   :  { %v3000_v26 = vpop.eup %2999 }
 0x3f9   :  { %677 = vrot.lane.b32.xlu0 %v3000_v26, %s3188_s28 }
 0x3fa   :  { %2619 = vmatmul.mubr.f32.gmra.mrb[10].mxu1 %v305_v5 }
 0x3fb   :  { %2621 = vmatprep.mubr.f32.mxu1 %v306_v6 }
 0x3fc   :  { %v3002_v27 = vpop.eup %3001 }
 0x3fd   :  { %679 = vrot.lane.b32.xlu1 %v3002_v27, %s3188_s28 }
 0x3fe   :  { %2622 = vmatmul.mubr.f32.gmra.mrb[12].mxu1 %v307_v7 }
 0x46b   :  { %v678_v33 = vpop.permute.xlu0 %677 }
 0x46c   :  { %v683_v34 = vmul.f32 %v678_v33, %v673_v32 }
 0x46e   :  { %v3417_v35 = vadd.f32 %v683_v34, %v574_v10  ;;  %v308_v10 = vld [vmem:[%s3648_s1 + $0x70] sm:$0xff] }
 0x46f   :  { %v680_v37 = vpop.permute.xlu1 %679  ;;  %2624 = vmatprep.mubr.f32.mxu1 %v308_v10 }
 0x470   :  { %v684_v38 = vmul.f32 %v680_v37, %v674_v36  ;;  %2657 = vmatprep.mubr.msk.f32.mxu0 %vm481_vm3, %v3417_v35  ;;  %2625 = vmatmul.mubr.f32.gmra.mrb[14].mxu1 %v309_v13 }
 0x472   :  { %v3421_v39 = vadd.f32 %v684_v38, %v575_v12 }
 0x474   :  { %2658 = vmatmul.mubr.msk.f32.vlgmr.msra.gmra.mrb[20].mxu0 %vm481_vm3, %v3421_v39 }
 0x475   :  { %2873 = vmatpush3.bf16.msra.mxu0 %v3377_v54 }
 0x476   :  { %2875 = vmatprep.subr.bf16.mxu0 %v3390_v8 }
 0x479   :  { %2877 = vmatpush3.bf16.msra.mxu0 %v3390_v8 }
 0x47a   :  { %2887 = vmatprep.subr.bf16.mxu0 %v3377_v54 }
 0x4c1   :  { %v2611_v17 = vpop.f32.mrb[4].mxu1 }
 0x4c2   :  { %v409_v18 = vadd.f32 %v2611_v17, %v3384_v55  ;;  %v403_v20 = vpop.f32.mrb[5].mxu1 }
 0x4c3   :  { %v404_v21 = vadd.f32 %v3384_v55, %v403_v20 }
 0x4c4   :  { %468 = vst.msk [vmem:[#allocation2 + $0x28] sm:$0xff] %vm462_vm2, %v409_v18 }
 0x4c5   :  { %467 = vst.msk [vmem:[#allocation2 + $0x20] sm:$0xff] %vm462_vm2, %v404_v21  ;;  %v2614_v23 = vpop.f32.mrb[6].mxu1 }
 0x4c6   :  { %v419_v25 = vadd.f32 %v2614_v23, %v3384_v55  ;;  %v413_v26 = vpop.f32.mrb[7].mxu1 }
 0x4c7   :  { %v414_v27 = vadd.f32 %v3384_v55, %v413_v26 }
 0x4c8   :  { %470 = vst.msk [vmem:[#allocation2 + $0x38] sm:$0xff] %vm462_vm2, %v419_v25 }
 0x4c9   :  { %469 = vst.msk [vmem:[#allocation2 + $0x30] sm:$0xff] %vm462_vm2, %v414_v27  ;;  %v2617_v28 = vpop.f32.mrb[8].mxu1 }
 0x4ca   :  { %v429_v29 = vadd.f32 %v2617_v28, %v3384_v55  ;;  %v423_v30 = vpop.f32.mrb[9].mxu1 }
 0x4cb   :  { %v424_v31 = vadd.f32 %v3384_v55, %v423_v30 }
 0x4cc   :  { %472 = vst.msk [vmem:[#allocation2 + $0x48] sm:$0xff] %vm462_vm2, %v429_v29 }
 0x4cd   :  { %471 = vst.msk [vmem:[#allocation2 + $0x40] sm:$0xff] %vm462_vm2, %v424_v31  ;;  %v2620_v32 = vpop.f32.mrb[10].mxu1 }
 0x4ce   :  { %v439_v33 = vadd.f32 %v2620_v32, %v3384_v55  ;;  %v433_v34 = vpop.f32.mrb[11].mxu1 }
 0x4cf   :  { %v434_v36 = vadd.f32 %v3384_v55, %v433_v34  ;;  %v1123_v31 = vld [vmem:[#allocation2 + $0x38] sm:$0xff] }
 0x4d0   :  { %474 = vst.msk [vmem:[#allocation2 + $0x58] sm:$0xff] %vm462_vm2, %v439_v33  ;;  %v1122_v34 = vld [vmem:[#allocation2 + $0x30] sm:$0xff] }
 0x4d1   :  { %473 = vst.msk [vmem:[#allocation2 + $0x50] sm:$0xff] %vm462_vm2, %v434_v36  ;;  %v2623_v37 = vpop.f32.mrb[12].mxu1 }
 0x4d2   :  { %v449_v38 = vadd.f32 %v2623_v37, %v3384_v55 }
 0x4d4   :  { %476 = vst.msk [vmem:[#allocation2 + $0x68] sm:$0xff] %vm462_vm2, %v449_v38 }
 0x547   :  { %v2659_v42 = vpop.f32.mrb[20].mxu0 }
 0x548   :  { %v772_v43 = vadd.f32 %v2659_v42, %v689_v40  ;;  %v762_v44 = vpop.f32.mrb[21].mxu0 }
 0x549   :  { %v771_v45 = vadd.f32 %v762_v44, %v688_v41 }
 0x54a   :  { %v2354_v46 = vmul.f32 -1.442695, %v772_v43 }
 0x54b   :  { %v2353_v47 = vmul.f32 -1.442695, %v771_v45 }
 0x54c   :  { %3003 = vpow2.f32 %v2354_v46 }
 0x54d   :  { %3005 = vpow2.f32 %v2353_v47 }
 0x556   :  { %v3004_v48 = vpop.eup %3003 }
 0x557   :  { %v3006_v49 = vpop.eup %3005  ;;  %v780_v50 = vadd.f32 1.0, %v3004_v48 }
 0x558   :  { %v779_v51 = vadd.f32 1.0, %v3006_v49 }
 0x559   :  { %3007 = vrcp.f32 %v780_v50 }
 0x55a   :  { %3009 = vrcp.f32 %v779_v51 }
 0x563   :  { %v3429_v52 = vpop.eup %3007 }
 0x564   :  { %v3431_v53 = vpop.eup %3009  ;;  %789 = vrot.lane.b32.xlu1 %v3429_v52, %s3187_s3  ;;  %v891_v42 = vsub.f32 1.0, %v3429_v52  ;;  %v889_v49 = vmul.f32 %v3429_v52, %v3421_v39 }
 0x565   :  { %787 = vrot.lane.b32.xlu0 %v3431_v53, %s3187_s3  ;;  %v890_v44 = vsub.f32 1.0, %v3431_v53  ;;  %v888_v47 = vmul.f32 %v3431_v53, %v3417_v35 }
 0x5d6   :  { %v790_v56 = vpop.permute.xlu1 %789 }
 0x5d7   :  { %v788_v57 = vpop.permute.xlu0 %787  ;;  %v794_v59 = vmul.f32 %v790_v56, %v3421_v39  ;;  %v906_v56 = vld [vmem:[#allocation2 + $0x28] sm:$0xff] }
 0x5d8   :  { %v793_v58 = vmul.f32 %v788_v57, %v3417_v35 }
 0x5da   :  { %2668 = vmatprep.mubr.msk.f32.mxu0 %vm481_vm3, %v793_v58 }
 0x5db   :  { %2669 = vmatmul.mubr.msk.f32.vlgmr.msra.gmra.mrb[22].mxu0 %vm481_vm3, %v794_v59  ;;  %v905_v59 = vld [vmem:[#allocation2 + $0x20] sm:$0xff] }
 0x5dc   :  { %2889 = vmatpush3.bf16.msra.mxu0 %v3377_v54 }
 0x5dd   :  { %2891 = vmatprep.subr.bf16.mxu0 %v3390_v8 }
 0x5e0   :  { %2893 = vmatpush3.bf16.msra.mxu0 %v3390_v8 }
 0x5e1   :  { %2903 = vmatprep.subr.bf16.mxu0 %v3377_v54 }
 0x6ae   :  { %v2670_v60 = vpop.f32.mrb[22].mxu0 }
 0x6af   :  { %880 = vrot.lane.b32.xlu1 %v2670_v60, %s3188_s28  ;;  %v867_v61 = vpop.f32.mrb[23].mxu0 }
 0x6b0   :  { %878 = vrot.lane.b32.xlu0 %v867_v61, %s3188_s28 }
 0x721   :  { %v881_v9 = vpop.permute.xlu1 %880 }
 0x722   :  { %v885_v11 = vadd.f32 %v881_v9, %v689_v40  ;;  %v879_v12 = vpop.permute.xlu0 %878  ;;  %v443_v40 = vpop.f32.mrb[13].mxu1 }
 0x723   :  { %v884_v14 = vadd.f32 %v879_v12, %v688_v41  ;;  %v444_v41 = vadd.f32 %v3384_v55, %v443_v40  ;;  %v2626_v35 = vpop.f32.mrb[14].mxu1 }
 0x724   :  { %3011 = vtanh.f32 %v885_v11  ;;  %v459_v39 = vadd.f32 %v2626_v35, %v3384_v55  ;;  %v453_v52 = vpop.f32.mrb[15].mxu1 }
 0x725   :  { %3013 = vtanh.f32 %v884_v14  ;;  %475 = vst.msk [vmem:[#allocation2 + $0x60] sm:$0xff] %vm462_vm2, %v444_v41  ;;  %v454_v53 = vadd.f32 %v3384_v55, %v453_v52 }
 0x726   :  { %478 = vst.msk [vmem:[#allocation2 + $0x78] sm:$0xff] %vm462_vm2, %v459_v39 }
 0x727   :  { %477 = vst.msk [vmem:[#allocation2 + $0x70] sm:$0xff] %vm462_vm2, %v454_v53 }
 0x72e   :  { %v3012_v15 = vpop.eup %3011 }
 0x72f   :  { %v3014_v16 = vpop.eup %3013  ;;  %896 = vrot.lane.b32.xlu1 %v3012_v15, %s3188_s28 }
 0x730   :  { %894 = vrot.lane.b32.xlu0 %v3014_v16, %s3188_s28 }
 0x7a1   :  { %v897_v43 = vpop.permute.xlu1 %896 }
 0x7a2   :  { %v901_v45 = vmul.f32 %v897_v43, %v891_v42  ;;  %v895_v46 = vpop.permute.xlu0 %894 }
 0x7a3   :  { %v900_v48 = vmul.f32 %v895_v46, %v890_v44 }
 0x7a4   :  { %v3513_v51 = vadd.f32 %v901_v45, %v889_v49 }
 0x7a5   :  { %v3511_v50 = vadd.f32 %v900_v48, %v888_v47 }
 0x7a7   :  { %2679 = vmatprep.mubr.msk.f32.mxu1 %vm481_vm3, %v3511_v50 }
 0x7a8   :  { %2680 = vmatmul.mubr.msk.f32.vlgmr.msra.gmra.mrb[16].mxu1 %vm481_vm3, %v3513_v51 }
 0x7a9   :  { %2897 = vmatpush3.bf16.msra.mxu1 %v3356_v19 }
 0x7aa   :  { %2899 = vmatprep.subr.bf16.mxu1 %v3360_v22 }
 0x7ad   :  { %2901 = vmatpush3.bf16.msra.mxu1 %v3360_v22 }
 0x7ae   :  { %2911 = vmatprep.subr.bf16.mxu1 %v3356_v19 }
 0x87b   :  { %v2681_v57 = vpop.f32.mrb[16].mxu1 }
 0x87c   :  { %v989_v58 = vadd.f32 %v2681_v57, %v906_v56  ;;  %v979_v60 = vpop.f32.mrb[17].mxu1 }
 0x87d   :  { %v988_v61 = vadd.f32 %v979_v60, %v905_v59 }
 0x87e   :  { %v2360_v62 = vmul.f32 -1.442695, %v989_v58 }
 0x87f   :  { %v2359_v63 = vmul.f32 -1.442695, %v988_v61 }
 0x880   :  { %3015 = vpow2.f32 %v2360_v62 }
 0x881   :  { %3017 = vpow2.f32 %v2359_v63 }
 0x88a   :  { %v3016_v0 = vpop.eup %3015 }
 0x88b   :  { %v3018_v1 = vpop.eup %3017  ;;  %v997_v2 = vadd.f32 1.0, %v3016_v0 }
 0x88c   :  { %v996_v3 = vadd.f32 1.0, %v3018_v1 }
 0x88d   :  { %3019 = vrcp.f32 %v997_v2 }
 0x88e   :  { %3021 = vrcp.f32 %v996_v3 }
 0x897   :  { %v3020_v55 = vpop.eup %3019 }
 0x898   :  { %v3022_v4 = vpop.eup %3021  ;;  %1006 = vrot.lane.b32.xlu1 %v3020_v55, %s3187_s3  ;;  %v1108_v18 = vsub.f32 1.0, %v3020_v55  ;;  %v1106_v28 = vmul.f32 %v3020_v55, %v3513_v51 }
 0x899   :  { %1004 = vrot.lane.b32.xlu0 %v3022_v4, %s3187_s3  ;;  %v1107_v21 = vsub.f32 1.0, %v3022_v4  ;;  %v1105_v26 = vmul.f32 %v3022_v4, %v3511_v50  ;;  %v1340_v4 = vld [vmem:[#allocation2 + $0x48] sm:$0xff] }
 0x90a   :  { %v1007_v5 = vpop.permute.xlu1 %1006 }
 0x90b   :  { %v1005_v6 = vpop.permute.xlu0 %1004  ;;  %v1011_v9 = vmul.f32 %v1007_v5, %v3513_v51 }
 0x90c   :  { %v1010_v7 = vmul.f32 %v1005_v6, %v3511_v50 }
 0x90e   :  { %2690 = vmatprep.mubr.msk.f32.mxu0 %vm481_vm3, %v1010_v7  ;;  %v1339_v7 = vld [vmem:[#allocation2 + $0x40] sm:$0xff] }
 0x90f   :  { %2691 = vmatmul.mubr.msk.f32.vlgmr.msra.gmra.mrb[24].mxu0 %vm481_vm3, %v1011_v9 }
 0x910   :  { %2905 = vmatpush3.bf16.msra.mxu0 %v3377_v54 }
 0x911   :  { %2907 = vmatprep.subr.bf16.mxu0 %v3390_v8 }
 0x914   :  { %2909 = vmatpush3.bf16.msra.mxu0 %v3390_v8 }
 0x915   :  { %2919 = vmatprep.subr.bf16.mxu0 %v3377_v54 }
 0x9e2   :  { %v2692_v10 = vpop.f32.mrb[24].mxu0 }
 0x9e3   :  { %1097 = vrot.lane.b32.xlu1 %v2692_v10, %s3188_s28  ;;  %v1084_v11 = vpop.f32.mrb[25].mxu0 }
 0x9e4   :  { %1095 = vrot.lane.b32.xlu0 %v1084_v11, %s3188_s28 }
 0xa55   :  { %v1098_v12 = vpop.permute.xlu1 %1097 }
 0xa56   :  { %v1102_v13 = vadd.f32 %v1098_v12, %v906_v56  ;;  %v1096_v14 = vpop.permute.xlu0 %1095 }
 0xa57   :  { %v1101_v15 = vadd.f32 %v1096_v14, %v905_v59 }
 0xa58   :  { %3023 = vtanh.f32 %v1102_v13 }
 0xa59   :  { %3025 = vtanh.f32 %v1101_v15 }
 0xa62   :  { %v3024_v16 = vpop.eup %3023 }
 0xa63   :  { %v3026_v17 = vpop.eup %3025  ;;  %1113 = vrot.lane.b32.xlu1 %v3024_v16, %s3188_s28 }
 0xa64   :  { %1111 = vrot.lane.b32.xlu0 %v3026_v17, %s3188_s28 }
 0xad5   :  { %v1114_v20 = vpop.permute.xlu1 %1113 }
 0xad6   :  { %v1118_v23 = vmul.f32 %v1114_v20, %v1108_v18  ;;  %v1112_v25 = vpop.permute.xlu0 %1111 }
 0xad7   :  { %v1117_v27 = vmul.f32 %v1112_v25, %v1107_v21 }
 0xad8   :  { %v1120_v30 = vadd.f32 %v1118_v23, %v1106_v28 }
 0xad9   :  { %v1119_v29 = vadd.f32 %v1117_v27, %v1105_v26 }
 0xadb   :  { %2701 = vmatprep.mubr.msk.f32.mxu1 %vm481_vm3, %v1119_v29 }
 0xadc   :  { %2702 = vmatmul.mubr.msk.f32.vlgmr.msra.gmra.mrb[18].mxu1 %vm481_vm3, %v1120_v30 }
 0xadd   :  { %2913 = vmatpush3.bf16.msra.mxu1 %v3356_v19 }
 0xade   :  { %2915 = vmatprep.subr.bf16.mxu1 %v3360_v22 }
 0xae1   :  { %2917 = vmatpush3.bf16.msra.mxu1 %v3360_v22 }
 0xae2   :  { %2927 = vmatprep.subr.bf16.mxu1 %v3356_v19 }
 0xbaf   :  { %v2703_v32 = vpop.f32.mrb[18].mxu1 }
 0xbb0   :  { %v1206_v33 = vadd.f32 %v2703_v32, %v1123_v31  ;;  %v1196_v36 = vpop.f32.mrb[19].mxu1 }
 0xbb1   :  { %v1205_v37 = vadd.f32 %v1196_v36, %v1122_v34 }
 0xbb2   :  { %v2366_v38 = vmul.f32 -1.442695, %v1206_v33 }
 0xbb3   :  { %v2365_v40 = vmul.f32 -1.442695, %v1205_v37 }
 0xbb4   :  { %3027 = vpow2.f32 %v2366_v38 }
 0xbb5   :  { %3029 = vpow2.f32 %v2365_v40 }
 0xbbe   :  { %v3028_v41 = vpop.eup %3027 }
 0xbbf   :  { %v3030_v42 = vpop.eup %3029  ;;  %v1214_v43 = vadd.f32 1.0, %v3028_v41 }
 0xbc0   :  { %v1213_v44 = vadd.f32 1.0, %v3030_v42 }
 0xbc1   :  { %3031 = vrcp.f32 %v1214_v43 }
 0xbc2   :  { %3033 = vrcp.f32 %v1213_v44 }
 0xbcb   :  { %v3032_v45 = vpop.eup %3031 }
 0xbcc   :  { %v3034_v46 = vpop.eup %3033  ;;  %1223 = vrot.lane.b32.xlu1 %v3032_v45, %s3187_s3  ;;  %v1325_v59 = vsub.f32 1.0, %v3032_v45  ;;  %v1323_v2 = vmul.f32 %v3032_v45, %v1120_v30 }
 0xbcd   :  { %1221 = vrot.lane.b32.xlu0 %v3034_v46, %s3187_s3  ;;  %v1324_v61 = vsub.f32 1.0, %v3034_v46  ;;  %v1322_v0 = vmul.f32 %v3034_v46, %v1119_v29  ;;  %v1557_v46 = vld [vmem:[#allocation2 + $0x58] sm:$0xff] }
 0xc3e   :  { %v1224_v47 = vpop.permute.xlu1 %1223 }
 0xc3f   :  { %v1222_v48 = vpop.permute.xlu0 %1221  ;;  %v1228_v50 = vmul.f32 %v1224_v47, %v1120_v30 }
 0xc40   :  { %v1227_v49 = vmul.f32 %v1222_v48, %v1119_v29 }
 0xc42   :  { %2712 = vmatprep.mubr.msk.f32.mxu0 %vm481_vm3, %v1227_v49  ;;  %v1556_v49 = vld [vmem:[#allocation2 + $0x50] sm:$0xff] }
 0xc43   :  { %2713 = vmatmul.mubr.msk.f32.vlgmr.msra.gmra.mrb[26].mxu0 %vm481_vm3, %v1228_v50 }
 0xc44   :  { %2921 = vmatpush3.bf16.msra.mxu0 %v3377_v54 }
 0xc45   :  { %2923 = vmatprep.subr.bf16.mxu0 %v3390_v8 }
 0xc48   :  { %2925 = vmatpush3.bf16.msra.mxu0 %v3390_v8 }
 0xc49   :  { %2935 = vmatprep.subr.bf16.mxu0 %v3377_v54 }
 0xd16   :  { %v2714_v51 = vpop.f32.mrb[26].mxu0 }
 0xd17   :  { %1314 = vrot.lane.b32.xlu1 %v2714_v51, %s3188_s28  ;;  %v1301_v35 = vpop.f32.mrb[27].mxu0 }
 0xd18   :  { %1312 = vrot.lane.b32.xlu0 %v1301_v35, %s3188_s28 }
 0xd89   :  { %v1315_v39 = vpop.permute.xlu1 %1314 }
 0xd8a   :  { %v1319_v52 = vadd.f32 %v1315_v39, %v1123_v31  ;;  %v1313_v53 = vpop.permute.xlu0 %1312 }
 0xd8b   :  { %v1318_v56 = vadd.f32 %v1313_v53, %v1122_v34 }
 0xd8c   :  { %3035 = vtanh.f32 %v1319_v52 }
 0xd8d   :  { %3037 = vtanh.f32 %v1318_v56 }
 0xd96   :  { %v3036_v57 = vpop.eup %3035 }
 0xd97   :  { %v3038_v58 = vpop.eup %3037  ;;  %1330 = vrot.lane.b32.xlu1 %v3036_v57, %s3188_s28 }
 0xd98   :  { %1328 = vrot.lane.b32.xlu0 %v3038_v58, %s3188_s28 }
 0xe09   :  { %v1331_v60 = vpop.permute.xlu1 %1330 }
 0xe0a   :  { %v1335_v62 = vmul.f32 %v1331_v60, %v1325_v59  ;;  %v1329_v63 = vpop.permute.xlu0 %1328 }
 0xe0b   :  { %v1334_v1 = vmul.f32 %v1329_v63, %v1324_v61 }
 0xe0c   :  { %v1337_v55 = vadd.f32 %v1335_v62, %v1323_v2 }
 0xe0d   :  { %v1336_v3 = vadd.f32 %v1334_v1, %v1322_v0 }
 0xe0f   :  { %2723 = vmatprep.mubr.msk.f32.mxu1 %vm481_vm3, %v1336_v3 }
 0xe10   :  { %2724 = vmatmul.mubr.msk.f32.vlgmr.msra.gmra.mrb[20].mxu1 %vm481_vm3, %v1337_v55 }
 0xe11   :  { %2929 = vmatpush3.bf16.msra.mxu1 %v3356_v19 }
 0xe12   :  { %2931 = vmatprep.subr.bf16.mxu1 %v3360_v22 }
 0xe15   :  { %2933 = vmatpush3.bf16.msra.mxu1 %v3360_v22 }
 0xe16   :  { %2943 = vmatprep.subr.bf16.mxu1 %v3356_v19 }
 0xee3   :  { %v2725_v5 = vpop.f32.mrb[20].mxu1 }
 0xee4   :  { %v1423_v6 = vadd.f32 %v2725_v5, %v1340_v4  ;;  %v1413_v9 = vpop.f32.mrb[21].mxu1 }
 0xee5   :  { %v1422_v10 = vadd.f32 %v1413_v9, %v1339_v7 }
 0xee6   :  { %v2372_v11 = vmul.f32 -1.442695, %v1423_v6 }
 0xee7   :  { %v2371_v12 = vmul.f32 -1.442695, %v1422_v10 }
 0xee8   :  { %3039 = vpow2.f32 %v2372_v11 }
 0xee9   :  { %3041 = vpow2.f32 %v2371_v12 }
 0xef2   :  { %v3040_v13 = vpop.eup %3039 }
 0xef3   :  { %v3042_v14 = vpop.eup %3041  ;;  %v1431_v15 = vadd.f32 1.0, %v3040_v13 }
 0xef4   :  { %v1430_v16 = vadd.f32 1.0, %v3042_v14 }
 0xef5   :  { %3043 = vrcp.f32 %v1431_v15 }
 0xef6   :  { %3045 = vrcp.f32 %v1430_v16 }
 0xeff   :  { %v3044_v17 = vpop.eup %3043 }
 0xf00   :  { %v3046_v18 = vpop.eup %3045  ;;  %1440 = vrot.lane.b32.xlu1 %v3044_v17, %s3187_s3  ;;  %v1542_v34 = vsub.f32 1.0, %v3044_v17  ;;  %v1540_v43 = vmul.f32 %v3044_v17, %v1337_v55 }
 0xf01   :  { %1438 = vrot.lane.b32.xlu0 %v3046_v18, %s3187_s3  ;;  %v1541_v37 = vsub.f32 1.0, %v3046_v18  ;;  %v1539_v41 = vmul.f32 %v3046_v18, %v1336_v3  ;;  %v1774_v18 = vld [vmem:[#allocation2 + $0x68] sm:$0xff] }
 0xf72   :  { %v1441_v20 = vpop.permute.xlu1 %1440 }
 0xf73   :  { %v1439_v21 = vpop.permute.xlu0 %1438  ;;  %v1445_v25 = vmul.f32 %v1441_v20, %v1337_v55 }
 0xf74   :  { %v1444_v23 = vmul.f32 %v1439_v21, %v1336_v3 }
 0xf76   :  { %2734 = vmatprep.mubr.msk.f32.mxu0 %vm481_vm3, %v1444_v23  ;;  %v1773_v23 = vld [vmem:[#allocation2 + $0x60] sm:$0xff] }
 0xf77   :  { %2735 = vmatmul.mubr.msk.f32.vlgmr.msra.gmra.mrb[28].mxu0 %vm481_vm3, %v1445_v25 }
 0xf78   :  { %2937 = vmatpush3.bf16.msra.mxu0 %v3377_v54 }
 0xf79   :  { %2939 = vmatprep.subr.bf16.mxu0 %v3390_v8 }
 0xf7c   :  { %2941 = vmatpush3.bf16.msra.mxu0 %v3390_v8 }
 0xf7d   :  { %2951 = vmatprep.subr.bf16.mxu0 %v3377_v54 }
0x104a   :  { %v2736_v26 = vpop.f32.mrb[28].mxu0 }
0x104b   :  { %1531 = vrot.lane.b32.xlu1 %v2736_v26, %s3188_s28  ;;  %v1518_v27 = vpop.f32.mrb[29].mxu0 }
0x104c   :  { %1529 = vrot.lane.b32.xlu0 %v1518_v27, %s3188_s28 }
0x10bd   :  { %v1532_v28 = vpop.permute.xlu1 %1531 }
0x10be   :  { %v1536_v29 = vadd.f32 %v1532_v28, %v1340_v4  ;;  %v1530_v30 = vpop.permute.xlu0 %1529 }
0x10bf   :  { %v1535_v31 = vadd.f32 %v1530_v30, %v1339_v7 }
0x10c0   :  { %3047 = vtanh.f32 %v1536_v29 }
0x10c1   :  { %3049 = vtanh.f32 %v1535_v31 }
0x10ca   :  { %v3048_v32 = vpop.eup %3047 }
0x10cb   :  { %v3050_v33 = vpop.eup %3049  ;;  %1547 = vrot.lane.b32.xlu1 %v3048_v32, %s3188_s28 }
0x10cc   :  { %1545 = vrot.lane.b32.xlu0 %v3050_v33, %s3188_s28 }
0x113d   :  { %v1548_v36 = vpop.permute.xlu1 %1547 }
0x113e   :  { %v1552_v38 = vmul.f32 %v1548_v36, %v1542_v34  ;;  %v1546_v40 = vpop.permute.xlu0 %1545 }
0x113f   :  { %v1551_v42 = vmul.f32 %v1546_v40, %v1541_v37 }
0x1140   :  { %v1554_v45 = vadd.f32 %v1552_v38, %v1540_v43 }
0x1141   :  { %v1553_v44 = vadd.f32 %v1551_v42, %v1539_v41 }
0x1143   :  { %2745 = vmatprep.mubr.msk.f32.mxu1 %vm481_vm3, %v1553_v44 }
0x1144   :  { %2746 = vmatmul.mubr.msk.f32.vlgmr.msra.gmra.mrb[22].mxu1 %vm481_vm3, %v1554_v45 }
0x1145   :  { %2945 = vmatpush3.bf16.msra.mxu1 %v3356_v19 }
0x1146   :  { %2947 = vmatprep.subr.bf16.mxu1 %v3360_v22 }
0x1149   :  { %2949 = vmatpush3.bf16.msra.mxu1 %v3360_v22 }
0x114a   :  { %2959 = vmatprep.subr.bf16.mxu1 %v3356_v19 }
0x1217   :  { %v2747_v47 = vpop.f32.mrb[22].mxu1 }
0x1218   :  { %v1640_v48 = vadd.f32 %v2747_v47, %v1557_v46  ;;  %v1630_v50 = vpop.f32.mrb[23].mxu1 }
0x1219   :  { %v1639_v51 = vadd.f32 %v1630_v50, %v1556_v49 }
0x121a   :  { %v2378_v35 = vmul.f32 -1.442695, %v1640_v48 }
0x121b   :  { %v2377_v39 = vmul.f32 -1.442695, %v1639_v51 }
0x121c   :  { %3051 = vpow2.f32 %v2378_v35 }
0x121d   :  { %3053 = vpow2.f32 %v2377_v39 }
0x1226   :  { %v3052_v52 = vpop.eup %3051 }
0x1227   :  { %v3054_v53 = vpop.eup %3053  ;;  %v1648_v56 = vadd.f32 1.0, %v3052_v52 }
0x1228   :  { %v1647_v57 = vadd.f32 1.0, %v3054_v53  ;;  %v1991_v53 = vld [vmem:[#allocation2 + $0x78] sm:$0xff] }
0x1229   :  { %3055 = vrcp.f32 %v1648_v56 }
0x122a   :  { %3057 = vrcp.f32 %v1647_v57 }
0x1233   :  { %v3056_v58 = vpop.eup %3055 }
0x1234   :  { %v3058_v59 = vpop.eup %3057  ;;  %1657 = vrot.lane.b32.xlu1 %v3056_v58, %s3187_s3  ;;  %v1759_v7 = vsub.f32 1.0, %v3056_v58  ;;  %v1757_v15 = vmul.f32 %v3056_v58, %v1554_v45  ;;  %v1990_v58 = vld [vmem:[#allocation2 + $0x70] sm:$0xff] }
0x1235   :  { %1655 = vrot.lane.b32.xlu0 %v3058_v59, %s3187_s3  ;;  %v1758_v10 = vsub.f32 1.0, %v3058_v59  ;;  %v1756_v13 = vmul.f32 %v3058_v59, %v1553_v44 }
0x12a6   :  { %v1658_v60 = vpop.permute.xlu1 %1657 }
0x12a7   :  { %v1656_v61 = vpop.permute.xlu0 %1655  ;;  %v1662_v63 = vmul.f32 %v1658_v60, %v1554_v45 }
0x12a8   :  { %v1661_v62 = vmul.f32 %v1656_v61, %v1553_v44 }
0x12aa   :  { %2756 = vmatprep.mubr.msk.f32.mxu0 %vm481_vm3, %v1661_v62 }
0x12ab   :  { %2757 = vmatmul.mubr.msk.f32.vlgmr.msra.gmra.mrb[30].mxu0 %vm481_vm3, %v1662_v63 }
0x12ac   :  { %2953 = vmatpush3.bf16.msra.mxu0 %v3377_v54 }
0x12ad   :  { %2955 = vmatprep.subr.bf16.mxu0 %v3390_v8 }
0x12b0   :  { %2957 = vmatpush3.bf16.msra.mxu0 %v3390_v8 }
0x12b1   :  { %2967 = vmatprep.subr.bf16.mxu0 %v3377_v54 }
0x137e   :  { %v2758_v0 = vpop.f32.mrb[30].mxu0 }
0x137f   :  { %1748 = vrot.lane.b32.xlu1 %v2758_v0, %s3188_s28  ;;  %v1735_v1 = vpop.f32.mrb[31].mxu0 }
0x1380   :  { %1746 = vrot.lane.b32.xlu0 %v1735_v1, %s3188_s28 }
0x13f1   :  { %v1749_v2 = vpop.permute.xlu1 %1748 }
0x13f2   :  { %v1753_v3 = vadd.f32 %v1749_v2, %v1557_v46  ;;  %v1747_v55 = vpop.permute.xlu0 %1746 }
0x13f3   :  { %v1752_v4 = vadd.f32 %v1747_v55, %v1556_v49 }
0x13f4   :  { %3059 = vtanh.f32 %v1753_v3 }
0x13f5   :  { %3061 = vtanh.f32 %v1752_v4 }
0x13fe   :  { %v3060_v5 = vpop.eup %3059 }
0x13ff   :  { %v3062_v6 = vpop.eup %3061  ;;  %1764 = vrot.lane.b32.xlu1 %v3060_v5, %s3188_s28 }
0x1400   :  { %1762 = vrot.lane.b32.xlu0 %v3062_v6, %s3188_s28 }
0x1471   :  { %v1765_v9 = vpop.permute.xlu1 %1764 }
0x1472   :  { %v1769_v11 = vmul.f32 %v1765_v9, %v1759_v7  ;;  %v1763_v12 = vpop.permute.xlu0 %1762 }
0x1473   :  { %v1768_v14 = vmul.f32 %v1763_v12, %v1758_v10 }
0x1474   :  { %v1771_v17 = vadd.f32 %v1769_v11, %v1757_v15 }
0x1475   :  { %v1770_v16 = vadd.f32 %v1768_v14, %v1756_v13 }
0x1477   :  { %2767 = vmatprep.mubr.msk.f32.mxu1 %vm481_vm3, %v1770_v16 }
0x1478   :  { %2768 = vmatmul.mubr.msk.f32.vlgmr.msra.gmra.mrb[24].mxu1 %vm481_vm3, %v1771_v17 }
0x1479   :  { %2961 = vmatpush3.bf16.msra.mxu1 %v3356_v19 }
0x147a   :  { %2963 = vmatprep.subr.bf16.mxu1 %v3360_v22 }
0x147d   :  { %2965 = vmatpush3.bf16.msra.mxu1 %v3360_v22 }
0x154b   :  { %v2769_v20 = vpop.f32.mrb[24].mxu1 }
0x154c   :  { %v1857_v21 = vadd.f32 %v2769_v20, %v1774_v18  ;;  %v1847_v25 = vpop.f32.mrb[25].mxu1 }
0x154d   :  { %v1856_v26 = vadd.f32 %v1847_v25, %v1773_v23  ;;  %v2228_v25 = vld [vmem:[#allocation8 + $0x18] sm:$0xff] }
0x154e   :  { %v2384_v27 = vmul.f32 -1.442695, %v1857_v21  ;;  %v3189_v21 = vmov 0.0|0.0  }
0x154f   :  { %v2383_v28 = vmul.f32 -1.442695, %v1856_v26  ;;  %2974 = vmatprep.subr.bf16.mxu1 %v3189_v21 }
0x1550   :  { %3063 = vpow2.f32 %v2384_v27 }
0x1551   :  { %3065 = vpow2.f32 %v2383_v28 }
0x155a   :  { %v3064_v29 = vpop.eup %3063 }
0x155b   :  { %v3066_v30 = vpop.eup %3065  ;;  %v1865_v31 = vadd.f32 1.0, %v3064_v29 }
0x155c   :  { %v1864_v32 = vadd.f32 1.0, %v3066_v30 }
0x155d   :  { %3067 = vrcp.f32 %v1865_v31 }
0x155e   :  { %3069 = vrcp.f32 %v1864_v32 }
0x1567   :  { %v3068_v19 = vpop.eup %3067 }
0x1568   :  { %v3070_v33 = vpop.eup %3069  ;;  %1874 = vrot.lane.b32.xlu1 %v3068_v19, %s3187_s3  ;;  %v1974_v35 = vmul.f32 %v3068_v19, %v1771_v17 }
0x1569   :  { %1872 = vrot.lane.b32.xlu0 %v3070_v33, %s3187_s3  ;;  %v1975_v47 = vsub.f32 1.0, %v3070_v33  ;;  %v1973_v50 = vmul.f32 %v3070_v33, %v1770_v16 }
0x15da   :  { %v1875_v22 = vpop.permute.xlu1 %1874 }
0x15db   :  { %v1873_v34 = vpop.permute.xlu0 %1872  ;;  %v1879_v37 = vmul.f32 %v1875_v22, %v1771_v17  ;;  %v2225_v17 = vld [vmem:[#allocation8] sm:$0xff] }
0x15dc   :  { %v1878_v36 = vmul.f32 %v1873_v34, %v1770_v16 }
0x15de   :  { %2778 = vmatprep.mubr.msk.f32.mxu0 %vm481_vm3, %v1878_v36 }
0x15df   :  { %2779 = vmatmul.mubr.msk.f32.vlgmr.msra.gmra.mrb[32].mxu0 %vm481_vm3, %v1879_v37 }
0x15e0   :  { %2969 = vmatpush3.bf16.msra.mxu0 %v3377_v54  ;;  %v1976_v54 = vsub.f32 1.0, %v3068_v19 }
0x15e1   :  { %2971 = vmatprep.subr.bf16.mxu0 %v3390_v8 }
0x15e4   :  { %2973 = vmatpush3.bf16.msra.mxu0 %v3390_v8 }
0x16b2   :  { %v2780_v38 = vpop.f32.mrb[32].mxu0 }
0x16b3   :  { %1965 = vrot.lane.b32.xlu1 %v2780_v38, %s3188_s28  ;;  %v1952_v40 = vpop.f32.mrb[33].mxu0 }
0x16b4   :  { %1963 = vrot.lane.b32.xlu0 %v1952_v40, %s3188_s28 }
0x1725   :  { %v1966_v41 = vpop.permute.xlu1 %1965 }
0x1726   :  { %v1970_v42 = vadd.f32 %v1966_v41, %v1774_v18  ;;  %v1964_v43 = vpop.permute.xlu0 %1963  ;;  %v2226_v18 = vld [vmem:[#allocation8 + $0x8] sm:$0xff] }
0x1727   :  { %v1969_v44 = vadd.f32 %v1964_v43, %v1773_v23  ;;  %v2975_v20 = vpack.c.bf16 %v2226_v18, %v2225_v17  ;;  %v2227_v23 = vld [vmem:[#allocation8 + $0x10] sm:$0xff] }
0x1728   :  { %3071 = vtanh.f32 %v1970_v42  ;;  %v2978_v26 = vpack.c.bf16 %v2228_v25, %v2227_v23 }
0x1729   :  { %3073 = vtanh.f32 %v1969_v44 }
0x1732   :  { %v3072_v45 = vpop.eup %3071 }
0x1733   :  { %v3074_v46 = vpop.eup %3073  ;;  %1981 = vrot.lane.b32.xlu1 %v3072_v45, %s3188_s28 }
0x1734   :  { %1979 = vrot.lane.b32.xlu0 %v3074_v46, %s3188_s28 }
0x17a5   :  { %v1982_v8 = vpop.permute.xlu1 %1981 }
0x17a6   :  { %v1986_v48 = vmul.f32 %v1982_v8, %v1976_v54  ;;  %v1980_v49 = vpop.permute.xlu0 %1979 }
0x17a7   :  { %v1985_v51 = vmul.f32 %v1980_v49, %v1975_v47 }
0x17a8   :  { %v1988_v52 = vadd.f32 %v1986_v48, %v1974_v35 }
0x17a9   :  { %v3613_v39 = vadd.f32 %v1985_v51, %v1973_v50 }
0x17ab   :  { %2789 = vmatprep.mubr.msk.f32.mxu1 %vm481_vm3, %v3613_v39 }
0x17ac   :  { %2790 = vmatmul.mubr.msk.f32.vlgmr.msra.gmra.mrb[26].mxu1 %vm481_vm3, %v1988_v52 }
0x17ad   :  { %2976 = vmatpush3.bf16.msra.mxu1 %v2975_v20  ;;  %2811 = vmatprep.mubr.msk.f32.mxu1 %vm3190_vm4, %v3186_v24 }
0x17ae   :  { %2977 = vmatprep.subr.bf16.mxu1 %v3189_v21 }
0x17b1   :  { %2979 = vmatpush3.bf16.msra.mxu1 %v2978_v26 }
0x187f   :  { %v2791_v56 = vpop.f32.mrb[26].mxu1 }
0x1880   :  { %v2074_v57 = vadd.f32 %v2791_v56, %v1991_v53  ;;  %v2064_v59 = vpop.f32.mrb[27].mxu1 }
0x1881   :  { %v2073_v60 = vadd.f32 %v2064_v59, %v1990_v58 }
0x1882   :  { %v2390_v61 = vmul.f32 -1.442695, %v2074_v57 }
0x1883   :  { %v2389_v62 = vmul.f32 -1.442695, %v2073_v60 }
0x1884   :  { %3075 = vpow2.f32 %v2390_v61 }
0x1885   :  { %3077 = vpow2.f32 %v2389_v62 }
0x188e   :  { %v3076_v63 = vpop.eup %3075 }
0x188f   :  { %v3078_v0 = vpop.eup %3077  ;;  %v2082_v1 = vadd.f32 1.0, %v3076_v63 }
0x1890   :  { %v2081_v2 = vadd.f32 1.0, %v3078_v0 }
0x1891   :  { %3079 = vrcp.f32 %v2082_v1 }
0x1892   :  { %3081 = vrcp.f32 %v2081_v2 }
0x189b   :  { %v3080_v3 = vpop.eup %3079 }
0x189c   :  { %v3082_v55 = vpop.eup %3081  ;;  %2091 = vrot.lane.b32.xlu1 %v3080_v3, %s3187_s3  ;;  %v2193_v27 = vsub.f32 1.0, %v3080_v3  ;;  %v2191_v30 = vmul.f32 %v3080_v3, %v1988_v52 }
0x189d   :  { %2089 = vrot.lane.b32.xlu0 %v3082_v55, %s3187_s3  ;;  %v2192_v29 = vsub.f32 1.0, %v3082_v55  ;;  %v2190_v19 = vmul.f32 %v3082_v55, %v3613_v39 }
0x190e   :  { %v2092_v4 = vpop.permute.xlu1 %2091 }
0x190f   :  { %v2090_v5 = vpop.permute.xlu0 %2089  ;;  %v2096_v7 = vmul.f32 %v2092_v4, %v1988_v52 }
0x1910   :  { %v2095_v6 = vmul.f32 %v2090_v5, %v3613_v39  ;;  %v2393_v39 = vld [vmem:[%s3654_s7] ss:$0 sm:$0xff] }
0x1912   :  { %2800 = vmatprep.mubr.msk.f32.mxu0 %vm481_vm3, %v2095_v6 }
0x1913   :  { %2801 = vmatmul.mubr.msk.f32.vlgmr.msra.gmra.mrb[34].mxu0 %vm481_vm3, %v2096_v7 }
0x19e6   :  { %v2802_v9 = vpop.f32.mrb[34].mxu0 }
0x19e7   :  { %2182 = vrot.lane.b32.xlu1 %v2802_v9, %s3188_s28  ;;  %v2169_v10 = vpop.f32.mrb[35].mxu0 }
0x19e8   :  { %2180 = vrot.lane.b32.xlu0 %v2169_v10, %s3188_s28 }
0x1a59   :  { %v2183_v11 = vpop.permute.xlu1 %2182 }
0x1a5a   :  { %v2187_v12 = vadd.f32 %v2183_v11, %v1991_v53  ;;  %v2181_v13 = vpop.permute.xlu0 %2180 }
0x1a5b   :  { %v2186_v14 = vadd.f32 %v2181_v13, %v1990_v58 }
0x1a5c   :  { %3083 = vtanh.f32 %v2187_v12 }
0x1a5d   :  { %3085 = vtanh.f32 %v2186_v14 }
0x1a66   :  { %v3084_v15 = vpop.eup %3083 }
0x1a67   :  { %v3086_v16 = vpop.eup %3085  ;;  %2198 = vrot.lane.b32.xlu1 %v3084_v15, %s3188_s28 }
0x1a68   :  { %2196 = vrot.lane.b32.xlu0 %v3086_v16, %s3188_s28  ;;  %s3191_s28 = smov [#allocation9]  }
0x1a69   :  { %s2319_s11 = sshll.u32 %s3191_s28, 4  ;;  %s2320_s11 = int_to_ptr.vmem [resolvable:$true] %s2319_s11 }
0x1a6a   :  { %s3153_s12 = scalar_lea.vmem %s2320_s11, 32  ;;  %p3158_p11 = scmp.lt.s32.totalorder %s2320_s11, %s2320_s11 }
0x1a6b   :  { %p3154_p10 = scmp.ne.s32.totalorder %s2320_s11, %s3153_s12  ;;  %p3159_p12 = scmp.lt.s32.totalorder %s3153_s12, %s3153_s12 }
0x1a6d   :  { %p3160_p13 = por %p3159_p12, %p3158_p11 }
0x1a6f   :  { %p3161_p0 = pnand %p3160_p13, %p3154_p10 }
0x1ad9   :  { %v2199_v28 = vpop.permute.xlu1 %2198 }
0x1ada   :  { %v2203_v31 = vmul.f32 %v2199_v28, %v2193_v27  ;;  %v2197_v32 = vpop.permute.xlu0 %2196 }
0x1adb   :  { %v2202_v33 = vmul.f32 %v2197_v32, %v2192_v29 }
0x1adc   :  { %v2205_v22 = vadd.f32 %v2203_v31, %v2191_v30 }
0x1add   :  { %v2204_v34 = vadd.f32 %v2202_v33, %v2190_v19 }
0x1ade   :  { %v2207_v36 = vmax.f32 %v2205_v22, 0.0 }
0x1adf   :  { %v2206_v37 = vmax.f32 %v2204_v34, 0.0 }
0x1ae0   :  { %v2215_v38 = vsel %vm481_vm3, %v2207_v36, 0.0 }
0x1ae1   :  { %v2216_v40 = vrot.slane %v2215_v38, 4  ;;  %v2208_v41 = vsel %vm481_vm3, %v2206_v37, 0.0 }
0x1ae2   :  { %v2209_v24 = vrot.slane %v2208_v41, 4 }
0x1ae3   :  { %v2217_v42 = vadd.f32 %v2216_v40, %v2215_v38 }
0x1ae4   :  { %v2210_v43 = vadd.f32 %v2209_v24, %v2208_v41 }
0x1ae5   :  { %v2218_v44 = vrot.slane %v2217_v42, 2 }
0x1ae6   :  { %v2211_v45 = vrot.slane %v2210_v43, 2 }
0x1ae7   :  { %v2219_v46 = vadd.f32 %v2218_v44, %v2217_v42 }
0x1ae8   :  { %v2212_v54 = vadd.f32 %v2211_v45, %v2210_v43 }
0x1ae9   :  { %v2220_v8 = vrot.slane %v2219_v46, 1 }
0x1aea   :  { %v2213_v47 = vrot.slane %v2212_v54, 1 }
0x1aeb   :  { %v2221_v48 = vadd.f32 %v2220_v8, %v2219_v46 }
0x1aec   :  { %v2214_v49 = vadd.f32 %v2213_v47, %v2212_v54 }
0x1aed   :  { %v2224_v50 = vmul.f32 0.125, %v2221_v48 }
0x1aee   :  { %v2223_v51 = vmul.f32 0.125, %v2214_v49 }
0x1af0   :  { %v2239_v35 = vsel %vm2238_vm5, %v2224_v50, %v2223_v51 }
0x1af1   :  { %2812 = vmatmul.mubr.msk.f32.vlgmr.msra.gmra.mrb[28].mxu1 %vm481_vm3, %v2239_v35 }
0x1bc4   :  { %v2308_v52 = vpop.f32.mrb[28].mxu1 }
0x1bc5   :  { %v2309_v53 = vadd.f32 %v2393_v39, %v2308_v52  ;;  %v2813_v56 = vpop.f32.mrb[29].mxu1 }
0x1bc7   :  { %2312 = vst [vmem:[#allocation9] sm:$0x3] %v2309_v53 }
0x1bc8   :  { %3164 = shalt.err (!%p3161_p0)
}
0x1bc9   :  { %s3165_s15 = scalar_lea.hbm %s3655_s8, 32 }
0x1bca   :  { %p3166_p1 = scmp.ne.s32.totalorder %s3655_s8, %s3165_s15  ;;  %p3169_p2 = scmp.lt.u32.totalorder %s3165_s15, %s3655_s8 }
0x1bcc   :  { %p3171_p3 = pnand %p3169_p2, %p3166_p1 }
0x1bce   :  { %3174 = shalt.err (!%p3171_p3)
}
0x1bcf   :  { %2322 = dma.vmem_to_hbm [thread:$0]  %s2320_s11, 32, %s3655_s8, [#allocation5]  }
0x1bd0   :  { %3179 = dma.done.wait [#allocation5], 32  }
0x1bd1   :  { %3180 = vsyncadd [#allocation5], 4294967264 }
0x1bd2   :  { %2326 = vsyncpa [#allocation4], 1 }
0x1bd3   :  { %2327 = vsyncpa [#allocation7], 1 }
0x1bd4   :  { %2328 = vsyncpa [#allocation5], 1 }

</bundles_post_ra>
